<compile_context>
chip_gen: v5e
topology: v5e:2x2
jax: 0.10.0
libtpu: 0.0.40
codegen_flags: <defaults>
</compile_context>

<pallas_src>
import functools

import jax
import jax.numpy as jnp
from jax import lax
from jax.experimental import pallas as pl
from jax.experimental.pallas import tpu as pltpu

EPS = 1e-5  # nn.BatchNorm1d default eps
_VMEM_LIMIT = 32 * 1024 * 1024


def _round_up(x, m):
    return ((x + m - 1) // m) * m


# ------------------------------------------------------------------ kernels --
def _conv_stats_kernel(xr_ref, hc_ref, w0_ref, w1_ref, w2_ref, *rest,
                       tm, c_in, l_in, l_out, n_tiles, fuse_input_bn):
    """One row-tile of Conv1d(k=3, s=2, p=1) + per-tile BN statistics.

    xr_ref : (tm, 2*c_in)  pair-reshaped previous activation (rows y[2j],y[2j+1])
    hc_ref : (1, 1, c_out) precomputed halo contribution act(y[2*i*tm-1]) @ W0
    w*_ref : (c_in, c_out) per-tap weights (VMEM-resident)
    s2/b2  : (1, 2*c_in)   fused input-BN scale/shift (only for layers 2,3)
    y_ref  : (tm, c_out)   pre-BN conv output (rows >= l_out forced to 0)
    stats  : (1, 2, c_out) per-tile [sum, sum-of-squares] (f32)
    """
    if fuse_input_bn:
        s2_ref, b2_ref, y_ref, stats_ref = rest
    else:
        y_ref, stats_ref = rest
    i = pl.program_id(0)

    def body(boundary):
        r = xr_ref[...]
        if fuse_input_bn:
            # previous layer's BatchNorm + ReLU applied on the fly
            a = jnp.maximum(r * s2_ref[...] + b2_ref[...], 0)
        else:
            a = r
        a = a.astype(w1_ref.dtype)
        a0 = a[:, :c_in]          # rows y[2j]   -> tap 1
        a1 = a[:, c_in:]          # rows y[2j+1] -> tap 2 (and tap 0 of row j+1)
        if boundary and fuse_input_bn:
            # zero activations of input rows >= l_in (conv right pad / unwritten
            # tail rows).  Only the last tile ever needs this.
            rowv = i * tm + lax.broadcasted_iota(jnp.int32, (tm, 1), 0)
            a0 = jnp.where(rowv <= (l_in - 1) // 2, a0, 0)
            a1 = jnp.where(rowv <= (l_in - 2) // 2, a1, 0)

        y = jnp.dot(a0, w1_ref[...], preferred_element_type=jnp.float32)
        y = y + jnp.dot(a1, w2_ref[...], preferred_element_type=jnp.float32)
        # tap 0: a1[j-1] @ W0 ; row 0 comes from the precomputed halo contrib.
        zp = jnp.dot(a1, w0_ref[...], preferred_element_type=jnp.float32)
        y = y + jnp.concatenate([hc_ref[0], zp[: tm - 1]], axis=0)

        if boundary:
            # zero rows past the true output length (keeps BN stats exact)
            orow = i * tm + lax.broadcasted_iota(jnp.int32, (tm, 1), 0)
            y = jnp.where(orow < l_out, y, 0.0)

        y_ref[...] = y.astype(y_ref.dtype)
        stats_ref[0, 0:1, :] = jnp.sum(y, axis=0, keepdims=True)
        stats_ref[0, 1:2, :] = jnp.sum(y * y, axis=0, keepdims=True)

    # interior tiles: no masks at all; boundary (last) tile: masked path.
    @pl.when(i < n_tiles - 1)
    def _():
        body(False)

    @pl.when(i == n_tiles - 1)
    def _():
        body(True)


def _head_kernel(y_ref, s_ref, b_ref, w_ref, bias_ref, o_ref):
    """Fused BN(layer 3) + ReLU + 1x1 conv head (lane-dense, padded to 128)."""
    a = jnp.maximum(y_ref[...] * s_ref[...] + b_ref[...], 0).astype(w_ref.dtype)
    o = jnp.dot(a, w_ref[...], preferred_element_type=jnp.float32)
    o_ref[...] = (o + bias_ref[...]).astype(o_ref.dtype)


# ----------------------------------------------------------------- wrappers --
def _halo_contrib(src, n, t, w0, scale, shift, compute_dtype):
    """(n, 1, c_out) f32: act(src[2*i*t - 1]) @ W0 for i>=1, zeros for i==0."""
    c_out = w0.shape[1]
    if n <= 1:
        return jnp.zeros((1, 1, c_out), jnp.float32)
    rows = src[2 * t - 1: 2 * t * (n - 1): 2 * t]            # (n-1, c_in)
    if scale is not None:
        rows = jnp.maximum(rows.astype(jnp.float32) * scale[None, :]
                           + shift[None, :], 0.0)
    hc = jnp.dot(rows.astype(compute_dtype), w0,
                 preferred_element_type=jnp.float32)          # (n-1, c_out)
    hc = jnp.concatenate([jnp.zeros((1, c_out), jnp.float32), hc], axis=0)
    return hc[:, None, :]


def _conv_layer(a_store, w0, w1, w2, hc, s2, b2, *, l_in, l_out, t, n,
                store_rows, fuse_input_bn, compute_dtype):
    """a_store: (rows, c_in) previous activation storage (rows >= 2*n*t)."""
    c_in, c_out = w0.shape
    m_rows = a_store.shape[0]
    assert m_rows % 2 == 0 and m_rows >= 2 * n * t
    xr = a_store.reshape(m_rows // 2, 2 * c_in)               # free reshape

    kernel = functools.partial(
        _conv_stats_kernel, tm=t, c_in=c_in, l_in=l_in, l_out=l_out,
        n_tiles=n, fuse_input_bn=fuse_input_bn)

    in_specs = [
        pl.BlockSpec((t, 2 * c_in), lambda i: (i, 0)),
        pl.BlockSpec((1, 1, c_out), lambda i: (i, 0, 0)),
        pl.BlockSpec((c_in, c_out), lambda i: (0, 0)),        # resident
        pl.BlockSpec((c_in, c_out), lambda i: (0, 0)),        # resident
        pl.BlockSpec((c_in, c_out), lambda i: (0, 0)),        # resident
    ]
    operands = [xr, hc, w0, w1, w2]
    if fuse_input_bn:
        in_specs += [pl.BlockSpec((1, 2 * c_in), lambda i: (0, 0)),
                     pl.BlockSpec((1, 2 * c_in), lambda i: (0, 0))]
        operands += [s2, b2]

    y, stats = pl.pallas_call(
        kernel,
        grid=(n,),
        in_specs=in_specs,
        out_specs=[
            pl.BlockSpec((t, c_out), lambda i: (i, 0)),
            pl.BlockSpec((1, 2, c_out), lambda i: (i, 0, 0)),
        ],
        out_shape=[
            # store_rows >= n*t: extra (unwritten) rows only ever reach the
            # next layer's boundary tile, which masks them out.
            jax.ShapeDtypeStruct((store_rows, c_out), compute_dtype),
            jax.ShapeDtypeStruct((n, 2, c_out), jnp.float32),
        ],
        compiler_params=pltpu.CompilerParams(
            dimension_semantics=("parallel",),
            vmem_limit_bytes=_VMEM_LIMIT),
    )(*operands)
    return y, stats


def _head_layer(y, scale, shift, w4, b4, *, t, n):
    m_rows, c = y.shape
    c_head = w4.shape[1]
    return pl.pallas_call(
        _head_kernel,
        grid=(n,),
        in_specs=[
            pl.BlockSpec((t, c), lambda i: (i, 0)),
            pl.BlockSpec((1, c), lambda i: (0, 0)),
            pl.BlockSpec((1, c), lambda i: (0, 0)),
            pl.BlockSpec((c, c_head), lambda i: (0, 0)),
            pl.BlockSpec((1, c_head), lambda i: (0, 0)),
        ],
        out_specs=pl.BlockSpec((t, c_head), lambda i: (i, 0)),
        out_shape=jax.ShapeDtypeStruct((n * t, c_head), jnp.float32),
        compiler_params=pltpu.CompilerParams(
            dimension_semantics=("parallel",),
            vmem_limit_bytes=_VMEM_LIMIT),
    )(y, scale, shift, w4, b4)


def _bn_affine(stats, gamma, beta, l_out):
    tot = jnp.sum(stats, axis=0)                 # (2, c_out)
    mean = tot[0] / l_out
    var = jnp.maximum(tot[1] / l_out - mean * mean, 0.0)   # biased var (PyTorch)
    scale = gamma.astype(jnp.float32) * lax.rsqrt(var + EPS)
    shift = beta.astype(jnp.float32) - mean * scale
    return scale, shift


def _prep_conv_weights(w_pt, c_in_pad, dtype):
    # w_pt: (c_out, c_in, 3) in PyTorch Conv1d layout.
    c_out, c_in, _ = w_pt.shape
    w = jnp.pad(w_pt, ((0, 0), (0, c_in_pad - c_in), (0, 0)))
    return tuple(w[:, :, k].T.astype(dtype) for k in range(3))  # (c_in_pad, c_out)


def conv_model_forward(x, params, target_length=17177,
                       compute_dtype=jnp.bfloat16, tm=1024, bn_dtype=None):
    """x: (L, input_dim) -> (min(L_out3, target_length), output_dim)."""
    L, in_dim = x.shape
    blocks = params["blocks"]
    w4_pt, b4 = params["head"]
    out_dim = w4_pt.shape[0]
    n_blocks = len(blocks)
    bn_dtype = compute_dtype if bn_dtype is None else bn_dtype

    # ---- static geometry planning (all Python ints) ----
    l_outs, l = [], L
    for _ in range(n_blocks):
        l = (l - 1) // 2 + 1
        l_outs.append(l)
    tms, ns, m_pads = [], [], []
    for lo in l_outs:
        t = min(tm, _round_up(lo, 8))
        n = pl.cdiv(lo, t)
        tms.append(t)
        ns.append(n)
        m_pads.append(n * t)
    store_rows = [max(m_pads[k], 2 * m_pads[k + 1]) if k + 1 < n_blocks
                  else m_pads[k] for k in range(n_blocks)]

    # ---- layer-1 input prep: single fused pad (rows + channels) + cast ----
    c0 = _round_up(in_dim, 128)
    a = jnp.pad(x, ((0, 2 * m_pads[0] - L), (0, c0 - in_dim))).astype(compute_dtype)

    c_ins = [c0] + [blk[0].shape[0] for blk in blocks[:-1]]

    scale = shift = None
    l_in = L
    for k, (w_pt, _bias_unused, gamma, beta) in enumerate(blocks):
        # Conv bias dropped: a per-channel constant added before (batch-stats)
        # BatchNorm is exactly cancelled by the mean subtraction.
        w0, w1, w2 = _prep_conv_weights(w_pt, c_ins[k], compute_dtype)
        fuse = k > 0
        hc = _halo_contrib(a, ns[k], tms[k], w0,
                           scale if fuse else None, shift if fuse else None,
                           compute_dtype)
        if fuse:
            s2 = jnp.concatenate([scale, scale])[None, :].astype(bn_dtype)
            b2 = jnp.concatenate([shift, shift])[None, :].astype(bn_dtype)
        else:
            s2 = b2 = None
        a, stats = _conv_layer(
            a, w0, w1, w2, hc, s2, b2, l_in=l_in, l_out=l_outs[k],
            t=tms[k], n=ns[k], store_rows=store_rows[k],
            fuse_input_bn=fuse, compute_dtype=compute_dtype)
        scale, shift = _bn_affine(stats, gamma, beta, l_outs[k])
        l_in = l_outs[k]

    # ---- head: fused BN(3)+ReLU + 1x1 conv, lane-dense (39 -> 128 lanes) ----
    c_head = _round_up(out_dim, 128)
    w4 = jnp.pad(w4_pt[:, :, 0].T,
                 ((0, 0), (0, c_head - out_dim))).astype(compute_dtype)
    b4p = jnp.pad(b4, (0, c_head - out_dim)).astype(jnp.float32)[None, :]
    out = _head_layer(a, scale[None, :].astype(bn_dtype),
                      shift[None, :].astype(bn_dtype), w4, b4p,
                      t=tms[-1], n=ns[-1])
    return out[: min(l_outs[-1], target_length), :out_dim]


# ------------------------------------------------------- pure-JAX reference --
def ref_forward(x, params, target_length):
    h = x.T[None]  # (1, C_in, L) == x.permute(1,0).unsqueeze(0)
    for (w, b, g, be) in params["blocks"]:
        h = lax.conv_general_dilated(
            h, w, (2,), [(1, 1)], dimension_numbers=("NCH", "OIH", "NCH"))
        h = h + b[None, :, None]
        mean = jnp.mean(h, axis=(0, 2), keepdims=True)
        var = jnp.mean((h - mean) ** 2, axis=(0, 2), keepdims=True)
        h = (h - mean) * lax.rsqrt(var + EPS) * g[None, :, None] + be[None, :, None]
        h = jnp.maximum(h, 0.0)
    w4, b4 = params["head"]
    h = lax.conv_general_dilated(
        h, w4, (1,), [(0, 0)], dimension_numbers=("NCH", "OIH", "NCH"))
    h = h + b4[None, :, None]
    return h[:, :, :target_length][0].T


# --------------------------------------------------------------------- main --
if __name__ == "__main__":
    input_dim, output_dim, n = 66, 39, 1
    target_length = 17177  # no-op truncation at this small test length
    L = 64                 # output lengths: 64 -> 32 -> 16 -> 8

    keys = jax.random.split(jax.random.PRNGKey(0), 16)

    def w_init(k, shape, scale=0.05):
        return (scale * jax.random.normal(k, shape)).astype(jnp.float32)

    dims = [(input_dim, 128 * n), (128 * n, 256 * n), (256 * n, 128 * n)]
    blocks = []
    ki = 0
    for (cin, cout) in dims:
        w = w_init(keys[ki], (cout, cin, 3)); ki += 1
        b = w_init(keys[ki], (cout,)); ki += 1
        g = (1.0 + 0.1 * jax.random.normal(keys[ki], (cout,))).astype(jnp.float32); ki += 1
        be = w_init(keys[ki], (cout,)); ki += 1
        blocks.append((w, b, g, be))
    w4 = w_init(keys[ki], (output_dim, 128 * n, 1)); ki += 1
    b4 = w_init(keys[ki], (output_dim,)); ki += 1
    params = {"blocks": blocks, "head": (w4, b4)}

    x = jax.random.normal(keys[ki], (L, input_dim), dtype=jnp.float32)

    ref = ref_forward(x, params, target_length)

    # f32 compute path: tight check against the pure-JAX reference.
    fwd_f32 = jax.jit(lambda xx, pp: conv_model_forward(
        xx, pp, target_length, compute_dtype=jnp.float32))
    out_f32 = jax.block_until_ready(fwd_f32(x, params))
    assert out_f32.shape == ref.shape == (8, output_dim), (out_f32.shape, ref.shape)
    assert jnp.allclose(out_f32, ref, rtol=2e-3, atol=2e-3), float(
        jnp.max(jnp.abs(out_f32 - ref)))

    # bf16 compute path (default; MXU/VPU-friendly on v6e/v7x): loose check.
    fwd_bf16 = jax.jit(lambda xx, pp: conv_model_forward(
        xx, pp, target_length, compute_dtype=jnp.bfloat16))
    out_bf16 = jax.block_until_ready(fwd_bf16(x, params))
    assert out_bf16.shape == ref.shape
    assert jnp.allclose(out_bf16, ref, rtol=1e-1, atol=1e-1), float(
        jnp.max(jnp.abs(out_bf16 - ref)))

    print("KERNEL_OK")
</pallas_src>

<mosaic_0001>
module attributes {stable_mosaic.version = 11 : i64} {
  func.func @_conv_stats_kernel(%arg0: i32, %arg1: memref<32x256xf32, #tpu.memory_space<vmem>>, %arg2: memref<1x1x128xf32, #tpu.memory_space<vmem>>, %arg3: memref<128x128xf32, #tpu.memory_space<vmem>>, %arg4: memref<128x128xf32, #tpu.memory_space<vmem>>, %arg5: memref<128x128xf32, #tpu.memory_space<vmem>>, %arg6: memref<32x128xf32, #tpu.memory_space<vmem>>, %arg7: memref<1x2x128xf32, #tpu.memory_space<vmem>>) attributes {dimension_semantics = [#tpu.dimension_semantics<parallel>], iteration_bounds = array<i64: 1>, scalar_prefetch = 0 : i64, scratch_operands = 0 : i64, tpu.core_type = #tpu.core_type<tc>, window_params = [{transform_indices = @transform_0, window_bounds = array<i64: 32, 256>}, {transform_indices = @transform_1, window_bounds = array<i64: 1, 1, 128>}, {pipeline_mode = #tpu.pipeline_mode<synchronous>, transform_indices = @transform_2, window_bounds = array<i64: 128, 128>}, {pipeline_mode = #tpu.pipeline_mode<synchronous>, transform_indices = @transform_3, window_bounds = array<i64: 128, 128>}, {pipeline_mode = #tpu.pipeline_mode<synchronous>, transform_indices = @transform_4, window_bounds = array<i64: 128, 128>}, {transform_indices = @transform_5, window_bounds = array<i64: 32, 128>}, {transform_indices = @transform_6, window_bounds = array<i64: 1, 2, 128>}]} {
    %c0_i32 = arith.constant 0 : i32
    %0 = arith.cmpi slt, %arg0, %c0_i32 : i32
    %1 = arith.extui %0 : i1 to i32
    %c0_i32_0 = arith.constant 0 : i32
    %2 = arith.cmpi ne, %1, %c0_i32_0 : i32
    scf.if %2 {
      %c0 = arith.constant 0 : index
      %c0_3 = arith.constant 0 : index
      %6 = vector.load %arg1[%c0, %c0_3] : memref<32x256xf32, #tpu.memory_space<vmem>>, vector<32x256xf32>
      %7 = vector.extract_strided_slice %6 {offsets = [0, 0], sizes = [32, 128], strides = [1, 1]} : vector<32x256xf32> to vector<32x128xf32>
      %8 = vector.extract_strided_slice %6 {offsets = [0, 128], sizes = [32, 128], strides = [1, 1]} : vector<32x256xf32> to vector<32x128xf32>
      %c0_4 = arith.constant 0 : index
      %c0_5 = arith.constant 0 : index
      %9 = vector.load %arg4[%c0_4, %c0_5] : memref<128x128xf32, #tpu.memory_space<vmem>>, vector<128x128xf32>
      %cst = arith.constant dense<0.000000e+00> : vector<32x128xf32>
      %10 = tpu.matmul %7, %9, %cst {dimension_numbers = #tpu.dot_dimension_numbers<[1], [0], [0], [1], [0, 0, 1, 1], [], []>} : vector<32x128xf32>, vector<128x128xf32>, vector<32x128xf32> -> vector<32x128xf32>
      %c0_6 = arith.constant 0 : index
      %c0_7 = arith.constant 0 : index
      %11 = vector.load %arg5[%c0_6, %c0_7] : memref<128x128xf32, #tpu.memory_space<vmem>>, vector<128x128xf32>
      %cst_8 = arith.constant dense<0.000000e+00> : vector<32x128xf32>
      %12 = tpu.matmul %8, %11, %cst_8 {dimension_numbers = #tpu.dot_dimension_numbers<[1], [0], [0], [1], [0, 0, 1, 1], [], []>} : vector<32x128xf32>, vector<128x128xf32>, vector<32x128xf32> -> vector<32x128xf32>
      %13 = arith.addf %10, %12 : vector<32x128xf32>
      %c0_9 = arith.constant 0 : index
      %c0_10 = arith.constant 0 : index
      %14 = vector.load %arg3[%c0_9, %c0_10] : memref<128x128xf32, #tpu.memory_space<vmem>>, vector<128x128xf32>
      %cst_11 = arith.constant dense<0.000000e+00> : vector<32x128xf32>
      %15 = tpu.matmul %8, %14, %cst_11 {dimension_numbers = #tpu.dot_dimension_numbers<[1], [0], [0], [1], [0, 0, 1, 1], [], []>} : vector<32x128xf32>, vector<128x128xf32>, vector<32x128xf32> -> vector<32x128xf32>
      %c0_12 = arith.constant 0 : index
      %c0_13 = arith.constant 0 : index
      %c0_14 = arith.constant 0 : index
      %16 = vector.load %arg2[%c0_12, %c0_13, %c0_14] : memref<1x1x128xf32, #tpu.memory_space<vmem>>, vector<1x1x128xf32>
      %17 = vector.shape_cast %16 : vector<1x1x128xf32> to vector<1x128xf32>
      %18 = vector.extract_strided_slice %15 {offsets = [0, 0], sizes = [31, 128], strides = [1, 1]} : vector<32x128xf32> to vector<31x128xf32>
      %19 = tpu.concatenate %17, %18 in 0 : vector<1x128xf32>, vector<31x128xf32> -> vector<32x128xf32>
      %20 = arith.addf %13, %19 : vector<32x128xf32>
      %c0_15 = arith.constant 0 : index
      %c0_16 = arith.constant 0 : index
      %21 = vector.load %arg6[%c0_15, %c0_16] : memref<32x128xf32, #tpu.memory_space<vmem>>, vector<32x128xf32>
      tpu.vector_store %arg6[%c0_15, %c0_16], %20 {strides = array<i32>} : memref<32x128xf32, #tpu.memory_space<vmem>>, vector<32x128xf32>,
      %cst_17 = arith.constant dense<0.000000e+00> : vector<128xf32>
      %22 = vector.multi_reduction <add>, %20, %cst_17 [0] : vector<32x128xf32> to vector<128xf32>
      %23 = vector.shape_cast %22 : vector<128xf32> to vector<1x128xf32>
      %c0_18 = arith.constant 0 : index
      %c0_19 = arith.constant 0 : index
      %c0_20 = arith.constant 0 : index
      %24 = vector.load %arg7[%c0_18, %c0_19, %c0_20] : memref<1x2x128xf32, #tpu.memory_space<vmem>>, vector<1x1x128xf32>
      %25 = vector.shape_cast %24 : vector<1x1x128xf32> to vector<1x128xf32>
      %26 = vector.shape_cast %23 : vector<1x128xf32> to vector<1x1x128xf32>
      tpu.vector_store %arg7[%c0_18, %c0_19, %c0_20], %26 {strides = array<i32>} : memref<1x2x128xf32, #tpu.memory_space<vmem>>, vector<1x1x128xf32>,
      %27 = arith.mulf %20, %20 : vector<32x128xf32>
      %cst_21 = arith.constant dense<0.000000e+00> : vector<128xf32>
      %28 = vector.multi_reduction <add>, %27, %cst_21 [0] : vector<32x128xf32> to vector<128xf32>
      %29 = vector.shape_cast %28 : vector<128xf32> to vector<1x128xf32>
      %c0_22 = arith.constant 0 : index
      %c1 = arith.constant 1 : index
      %c0_23 = arith.constant 0 : index
      %30 = vector.load %arg7[%c0_22, %c1, %c0_23] : memref<1x2x128xf32, #tpu.memory_space<vmem>>, vector<1x1x128xf32>
      %31 = vector.shape_cast %30 : vector<1x1x128xf32> to vector<1x128xf32>
      %32 = vector.shape_cast %29 : vector<1x128xf32> to vector<1x1x128xf32>
      tpu.vector_store %arg7[%c0_22, %c1, %c0_23], %32 {strides = array<i32>} : memref<1x2x128xf32, #tpu.memory_space<vmem>>, vector<1x1x128xf32>,
    } else {
    }
    %c0_i32_1 = arith.constant 0 : i32
    %3 = arith.cmpi eq, %arg0, %c0_i32_1 : i32
    %4 = arith.extui %3 : i1 to i32
    %c0_i32_2 = arith.constant 0 : i32
    %5 = arith.cmpi ne, %4, %c0_i32_2 : i32
    scf.if %5 {
      %c0 = arith.constant 0 : index
      %c0_3 = arith.constant 0 : index
      %6 = vector.load %arg1[%c0, %c0_3] : memref<32x256xf32, #tpu.memory_space<vmem>>, vector<32x256xf32>
      %7 = vector.extract_strided_slice %6 {offsets = [0, 0], sizes = [32, 128], strides = [1, 1]} : vector<32x256xf32> to vector<32x128xf32>
      %8 = vector.extract_strided_slice %6 {offsets = [0, 128], sizes = [32, 128], strides = [1, 1]} : vector<32x256xf32> to vector<32x128xf32>
      %c0_4 = arith.constant 0 : index
      %c0_5 = arith.constant 0 : index
      %9 = vector.load %arg4[%c0_4, %c0_5] : memref<128x128xf32, #tpu.memory_space<vmem>>, vector<128x128xf32>
      %cst = arith.constant dense<0.000000e+00> : vector<32x128xf32>
      %10 = tpu.matmul %7, %9, %cst {dimension_numbers = #tpu.dot_dimension_numbers<[1], [0], [0], [1], [0, 0, 1, 1], [], []>} : vector<32x128xf32>, vector<128x128xf32>, vector<32x128xf32> -> vector<32x128xf32>
      %c0_6 = arith.constant 0 : index
      %c0_7 = arith.constant 0 : index
      %11 = vector.load %arg5[%c0_6, %c0_7] : memref<128x128xf32, #tpu.memory_space<vmem>>, vector<128x128xf32>
      %cst_8 = arith.constant dense<0.000000e+00> : vector<32x128xf32>
      %12 = tpu.matmul %8, %11, %cst_8 {dimension_numbers = #tpu.dot_dimension_numbers<[1], [0], [0], [1], [0, 0, 1, 1], [], []>} : vector<32x128xf32>, vector<128x128xf32>, vector<32x128xf32> -> vector<32x128xf32>
      %13 = arith.addf %10, %12 : vector<32x128xf32>
      %c0_9 = arith.constant 0 : index
      %c0_10 = arith.constant 0 : index
      %14 = vector.load %arg3[%c0_9, %c0_10] : memref<128x128xf32, #tpu.memory_space<vmem>>, vector<128x128xf32>
      %cst_11 = arith.constant dense<0.000000e+00> : vector<32x128xf32>
      %15 = tpu.matmul %8, %14, %cst_11 {dimension_numbers = #tpu.dot_dimension_numbers<[1], [0], [0], [1], [0, 0, 1, 1], [], []>} : vector<32x128xf32>, vector<128x128xf32>, vector<32x128xf32> -> vector<32x128xf32>
      %c0_12 = arith.constant 0 : index
      %c0_13 = arith.constant 0 : index
      %c0_14 = arith.constant 0 : index
      %16 = vector.load %arg2[%c0_12, %c0_13, %c0_14] : memref<1x1x128xf32, #tpu.memory_space<vmem>>, vector<1x1x128xf32>
      %17 = vector.shape_cast %16 : vector<1x1x128xf32> to vector<1x128xf32>
      %18 = vector.extract_strided_slice %15 {offsets = [0, 0], sizes = [31, 128], strides = [1, 1]} : vector<32x128xf32> to vector<31x128xf32>
      %19 = tpu.concatenate %17, %18 in 0 : vector<1x128xf32>, vector<31x128xf32> -> vector<32x128xf32>
      %20 = arith.addf %13, %19 : vector<32x128xf32>
      %c32_i32 = arith.constant 32 : i32
      %21 = arith.muli %arg0, %c32_i32 : i32
      %22 = tpu.iota {dimensions = array<i32: 0>} : vector<32x1xi32>
      %23 = vector.broadcast %21 : i32 to vector<32x1xi32>
      %24 = arith.addi %23, %22 : vector<32x1xi32>
      %c32_i32_15 = arith.constant 32 : i32
      %25 = vector.broadcast %c32_i32_15 : i32 to vector<32x1xi32>
      %26 = arith.cmpi slt, %24, %25 : vector<32x1xi32>
      %cst_16 = arith.constant 0.000000e+00 : f32
      %27 = vector.shape_cast %26 : vector<32x1xi1> to vector<32x1xi1>
      %28 = vector.broadcast %27 : vector<32x1xi1> to vector<32x128xi1>
      %29 = vector.broadcast %cst_16 : f32 to vector<32x128xf32>
      %30 = arith.select %28, %20, %29 : vector<32x128xi1>, vector<32x128xf32>
      %c0_17 = arith.constant 0 : index
      %c0_18 = arith.constant 0 : index
      %31 = vector.load %arg6[%c0_17, %c0_18] : memref<32x128xf32, #tpu.memory_space<vmem>>, vector<32x128xf32>
      tpu.vector_store %arg6[%c0_17, %c0_18], %30 {strides = array<i32>} : memref<32x128xf32, #tpu.memory_space<vmem>>, vector<32x128xf32>,
      %cst_19 = arith.constant dense<0.000000e+00> : vector<128xf32>
      %32 = vector.multi_reduction <add>, %30, %cst_19 [0] : vector<32x128xf32> to vector<128xf32>
      %33 = vector.shape_cast %32 : vector<128xf32> to vector<1x128xf32>
      %c0_20 = arith.constant 0 : index
      %c0_21 = arith.constant 0 : index
      %c0_22 = arith.constant 0 : index
      %34 = vector.load %arg7[%c0_20, %c0_21, %c0_22] : memref<1x2x128xf32, #tpu.memory_space<vmem>>, vector<1x1x128xf32>
      %35 = vector.shape_cast %34 : vector<1x1x128xf32> to vector<1x128xf32>
      %36 = vector.shape_cast %33 : vector<1x128xf32> to vector<1x1x128xf32>
      tpu.vector_store %arg7[%c0_20, %c0_21, %c0_22], %36 {strides = array<i32>} : memref<1x2x128xf32, #tpu.memory_space<vmem>>, vector<1x1x128xf32>,
      %37 = arith.mulf %30, %30 : vector<32x128xf32>
      %cst_23 = arith.constant dense<0.000000e+00> : vector<128xf32>
      %38 = vector.multi_reduction <add>, %37, %cst_23 [0] : vector<32x128xf32> to vector<128xf32>
      %39 = vector.shape_cast %38 : vector<128xf32> to vector<1x128xf32>
      %c0_24 = arith.constant 0 : index
      %c1 = arith.constant 1 : index
      %c0_25 = arith.constant 0 : index
      %40 = vector.load %arg7[%c0_24, %c1, %c0_25] : memref<1x2x128xf32, #tpu.memory_space<vmem>>, vector<1x1x128xf32>
      %41 = vector.shape_cast %40 : vector<1x1x128xf32> to vector<1x128xf32>
      %42 = vector.shape_cast %39 : vector<1x128xf32> to vector<1x1x128xf32>
      tpu.vector_store %arg7[%c0_24, %c1, %c0_25], %42 {strides = array<i32>} : memref<1x2x128xf32, #tpu.memory_space<vmem>>, vector<1x1x128xf32>,
    } else {
    }
    return
  }
  func.func @transform_0(%arg0: i32) -> (i32, i32) {
    %c0_i32 = arith.constant 0 : i32
    %c0_i32_0 = arith.constant 0 : i32
    return %arg0, %c0_i32 : i32, i32
  }
  func.func @transform_1(%arg0: i32) -> (i32, i32, i32) {
    %c0_i32 = arith.constant 0 : i32
    %c0_i32_0 = arith.constant 0 : i32
    %c0_i32_1 = arith.constant 0 : i32
    return %arg0, %c0_i32, %c0_i32_0 : i32, i32, i32
  }
  func.func @transform_2(%arg0: i32) -> (i32, i32) {
    %c0_i32 = arith.constant 0 : i32
    %c0_i32_0 = arith.constant 0 : i32
    %c0_i32_1 = arith.constant 0 : i32
    return %c0_i32, %c0_i32_0 : i32, i32
  }
  func.func @transform_3(%arg0: i32) -> (i32, i32) {
    %c0_i32 = arith.constant 0 : i32
    %c0_i32_0 = arith.constant 0 : i32
    %c0_i32_1 = arith.constant 0 : i32
    return %c0_i32, %c0_i32_0 : i32, i32
  }
  func.func @transform_4(%arg0: i32) -> (i32, i32) {
    %c0_i32 = arith.constant 0 : i32
    %c0_i32_0 = arith.constant 0 : i32
    %c0_i32_1 = arith.constant 0 : i32
    return %c0_i32, %c0_i32_0 : i32, i32
  }
  func.func @transform_5(%arg0: i32) -> (i32, i32) {
    %c0_i32 = arith.constant 0 : i32
    %c0_i32_0 = arith.constant 0 : i32
    return %arg0, %c0_i32 : i32, i32
  }
  func.func @transform_6(%arg0: i32) -> (i32, i32, i32) {
    %c0_i32 = arith.constant 0 : i32
    %c0_i32_0 = arith.constant 0 : i32
    %c0_i32_1 = arith.constant 0 : i32
    return %arg0, %c0_i32, %c0_i32_0 : i32, i32, i32
  }
}

module attributes {stable_mosaic.version = 11 : i64} {
  func.func @_conv_stats_kernel(%arg0: i32, %arg1: memref<16x256xf32, #tpu.memory_space<vmem>>, %arg2: memref<1x1x256xf32, #tpu.memory_space<vmem>>, %arg3: memref<128x256xf32, #tpu.memory_space<vmem>>, %arg4: memref<128x256xf32, #tpu.memory_space<vmem>>, %arg5: memref<128x256xf32, #tpu.memory_space<vmem>>, %arg6: memref<1x256xf32, #tpu.memory_space<vmem>>, %arg7: memref<1x256xf32, #tpu.memory_space<vmem>>, %arg8: memref<16x256xf32, #tpu.memory_space<vmem>>, %arg9: memref<1x2x256xf32, #tpu.memory_space<vmem>>) attributes {dimension_semantics = [#tpu.dimension_semantics<parallel>], iteration_bounds = array<i64: 1>, scalar_prefetch = 0 : i64, scratch_operands = 0 : i64, tpu.core_type = #tpu.core_type<tc>, window_params = [{transform_indices = @transform_0, window_bounds = array<i64: 16, 256>}, {transform_indices = @transform_1, window_bounds = array<i64: 1, 1, 256>}, {pipeline_mode = #tpu.pipeline_mode<synchronous>, transform_indices = @transform_2, window_bounds = array<i64: 128, 256>}, {pipeline_mode = #tpu.pipeline_mode<synchronous>, transform_indices = @transform_3, window_bounds = array<i64: 128, 256>}, {pipeline_mode = #tpu.pipeline_mode<synchronous>, transform_indices = @transform_4, window_bounds = array<i64: 128, 256>}, {pipeline_mode = #tpu.pipeline_mode<synchronous>, transform_indices = @transform_5, window_bounds = array<i64: 1, 256>}, {pipeline_mode = #tpu.pipeline_mode<synchronous>, transform_indices = @transform_6, window_bounds = array<i64: 1, 256>}, {transform_indices = @transform_7, window_bounds = array<i64: 16, 256>}, {transform_indices = @transform_8, window_bounds = array<i64: 1, 2, 256>}]} {
    %c0_i32 = arith.constant 0 : i32
    %0 = arith.cmpi slt, %arg0, %c0_i32 : i32
    %1 = arith.extui %0 : i1 to i32
    %c0_i32_0 = arith.constant 0 : i32
    %2 = arith.cmpi ne, %1, %c0_i32_0 : i32
    scf.if %2 {
      %c0 = arith.constant 0 : index
      %c0_3 = arith.constant 0 : index
      %6 = vector.load %arg1[%c0, %c0_3] : memref<16x256xf32, #tpu.memory_space<vmem>>, vector<16x256xf32>
      %c0_4 = arith.constant 0 : index
      %c0_5 = arith.constant 0 : index
      %7 = vector.load %arg6[%c0_4, %c0_5] : memref<1x256xf32, #tpu.memory_space<vmem>>, vector<1x256xf32>
      %8 = vector.broadcast %7 : vector<1x256xf32> to vector<16x256xf32>
      %9 = arith.mulf %6, %8 : vector<16x256xf32>
      %c0_6 = arith.constant 0 : index
      %c0_7 = arith.constant 0 : index
      %10 = vector.load %arg7[%c0_6, %c0_7] : memref<1x256xf32, #tpu.memory_space<vmem>>, vector<1x256xf32>
      %11 = vector.broadcast %10 : vector<1x256xf32> to vector<16x256xf32>
      %12 = arith.addf %9, %11 : vector<16x256xf32>
      %cst = arith.constant 0.000000e+00 : f32
      %13 = vector.broadcast %cst : f32 to vector<16x256xf32>
      %14 = arith.maximumf %12, %13 : vector<16x256xf32>
      %15 = vector.extract_strided_slice %14 {offsets = [0, 0], sizes = [16, 128], strides = [1, 1]} : vector<16x256xf32> to vector<16x128xf32>
      %16 = vector.extract_strided_slice %14 {offsets = [0, 128], sizes = [16, 128], strides = [1, 1]} : vector<16x256xf32> to vector<16x128xf32>
      %c0_8 = arith.constant 0 : index
      %c0_9 = arith.constant 0 : index
      %17 = vector.load %arg4[%c0_8, %c0_9] : memref<128x256xf32, #tpu.memory_space<vmem>>, vector<128x256xf32>
      %cst_10 = arith.constant dense<0.000000e+00> : vector<16x256xf32>
      %18 = tpu.matmul %15, %17, %cst_10 {dimension_numbers = #tpu.dot_dimension_numbers<[1], [0], [0], [1], [0, 0, 1, 1], [], []>} : vector<16x128xf32>, vector<128x256xf32>, vector<16x256xf32> -> vector<16x256xf32>
      %c0_11 = arith.constant 0 : index
      %c0_12 = arith.constant 0 : index
      %19 = vector.load %arg5[%c0_11, %c0_12] : memref<128x256xf32, #tpu.memory_space<vmem>>, vector<128x256xf32>
      %cst_13 = arith.constant dense<0.000000e+00> : vector<16x256xf32>
      %20 = tpu.matmul %16, %19, %cst_13 {dimension_numbers = #tpu.dot_dimension_numbers<[1], [0], [0], [1], [0, 0, 1, 1], [], []>} : vector<16x128xf32>, vector<128x256xf32>, vector<16x256xf32> -> vector<16x256xf32>
      %21 = arith.addf %18, %20 : vector<16x256xf32>
      %c0_14 = arith.constant 0 : index
      %c0_15 = arith.constant 0 : index
      %22 = vector.load %arg3[%c0_14, %c0_15] : memref<128x256xf32, #tpu.memory_space<vmem>>, vector<128x256xf32>
      %cst_16 = arith.constant dense<0.000000e+00> : vector<16x256xf32>
      %23 = tpu.matmul %16, %22, %cst_16 {dimension_numbers = #tpu.dot_dimension_numbers<[1], [0], [0], [1], [0, 0, 1, 1], [], []>} : vector<16x128xf32>, vector<128x256xf32>, vector<16x256xf32> -> vector<16x256xf32>
      %c0_17 = arith.constant 0 : index
      %c0_18 = arith.constant 0 : index
      %c0_19 = arith.constant 0 : index
      %24 = vector.load %arg2[%c0_17, %c0_18, %c0_19] : memref<1x1x256xf32, #tpu.memory_space<vmem>>, vector<1x1x256xf32>
      %25 = vector.shape_cast %24 : vector<1x1x256xf32> to vector<1x256xf32>
      %26 = vector.extract_strided_slice %23 {offsets = [0, 0], sizes = [15, 256], strides = [1, 1]} : vector<16x256xf32> to vector<15x256xf32>
      %27 = tpu.concatenate %25, %26 in 0 : vector<1x256xf32>, vector<15x256xf32> -> vector<16x256xf32>
      %28 = arith.addf %21, %27 : vector<16x256xf32>
      %c0_20 = arith.constant 0 : index
      %c0_21 = arith.constant 0 : index
      %29 = vector.load %arg8[%c0_20, %c0_21] : memref<16x256xf32, #tpu.memory_space<vmem>>, vector<16x256xf32>
      tpu.vector_store %arg8[%c0_20, %c0_21], %28 {strides = array<i32>} : memref<16x256xf32, #tpu.memory_space<vmem>>, vector<16x256xf32>,
      %cst_22 = arith.constant dense<0.000000e+00> : vector<256xf32>
      %30 = vector.multi_reduction <add>, %28, %cst_22 [0] : vector<16x256xf32> to vector<256xf32>
      %31 = vector.shape_cast %30 : vector<256xf32> to vector<1x256xf32>
      %c0_23 = arith.constant 0 : index
      %c0_24 = arith.constant 0 : index
      %c0_25 = arith.constant 0 : index
      %32 = vector.load %arg9[%c0_23, %c0_24, %c0_25] : memref<1x2x256xf32, #tpu.memory_space<vmem>>, vector<1x1x256xf32>
      %33 = vector.shape_cast %32 : vector<1x1x256xf32> to vector<1x256xf32>
      %34 = vector.shape_cast %31 : vector<1x256xf32> to vector<1x1x256xf32>
      tpu.vector_store %arg9[%c0_23, %c0_24, %c0_25], %34 {strides = array<i32>} : memref<1x2x256xf32, #tpu.memory_space<vmem>>, vector<1x1x256xf32>,
      %35 = arith.mulf %28, %28 : vector<16x256xf32>
      %cst_26 = arith.constant dense<0.000000e+00> : vector<256xf32>
      %36 = vector.multi_reduction <add>, %35, %cst_26 [0] : vector<16x256xf32> to vector<256xf32>
      %37 = vector.shape_cast %36 : vector<256xf32> to vector<1x256xf32>
      %c0_27 = arith.constant 0 : index
      %c1 = arith.constant 1 : index
      %c0_28 = arith.constant 0 : index
      %38 = vector.load %arg9[%c0_27, %c1, %c0_28] : memref<1x2x256xf32, #tpu.memory_space<vmem>>, vector<1x1x256xf32>
      %39 = vector.shape_cast %38 : vector<1x1x256xf32> to vector<1x256xf32>
      %40 = vector.shape_cast %37 : vector<1x256xf32> to vector<1x1x256xf32>
      tpu.vector_store %arg9[%c0_27, %c1, %c0_28], %40 {strides = array<i32>} : memref<1x2x256xf32, #tpu.memory_space<vmem>>, vector<1x1x256xf32>,
    } else {
    }
    %c0_i32_1 = arith.constant 0 : i32
    %3 = arith.cmpi eq, %arg0, %c0_i32_1 : i32
    %4 = arith.extui %3 : i1 to i32
    %c0_i32_2 = arith.constant 0 : i32
    %5 = arith.cmpi ne, %4, %c0_i32_2 : i32
    scf.if %5 {
      %c0 = arith.constant 0 : index
      %c0_3 = arith.constant 0 : index
      %6 = vector.load %arg1[%c0, %c0_3] : memref<16x256xf32, #tpu.memory_space<vmem>>, vector<16x256xf32>
      %c0_4 = arith.constant 0 : index
      %c0_5 = arith.constant 0 : index
      %7 = vector.load %arg6[%c0_4, %c0_5] : memref<1x256xf32, #tpu.memory_space<vmem>>, vector<1x256xf32>
      %8 = vector.broadcast %7 : vector<1x256xf32> to vector<16x256xf32>
      %9 = arith.mulf %6, %8 : vector<16x256xf32>
      %c0_6 = arith.constant 0 : index
      %c0_7 = arith.constant 0 : index
      %10 = vector.load %arg7[%c0_6, %c0_7] : memref<1x256xf32, #tpu.memory_space<vmem>>, vector<1x256xf32>
      %11 = vector.broadcast %10 : vector<1x256xf32> to vector<16x256xf32>
      %12 = arith.addf %9, %11 : vector<16x256xf32>
      %cst = arith.constant 0.000000e+00 : f32
      %13 = vector.broadcast %cst : f32 to vector<16x256xf32>
      %14 = arith.maximumf %12, %13 : vector<16x256xf32>
      %15 = vector.extract_strided_slice %14 {offsets = [0, 0], sizes = [16, 128], strides = [1, 1]} : vector<16x256xf32> to vector<16x128xf32>
      %16 = vector.extract_strided_slice %14 {offsets = [0, 128], sizes = [16, 128], strides = [1, 1]} : vector<16x256xf32> to vector<16x128xf32>
      %c16_i32 = arith.constant 16 : i32
      %17 = arith.muli %arg0, %c16_i32 : i32
      %18 = tpu.iota {dimensions = array<i32: 0>} : vector<16x1xi32>
      %19 = vector.broadcast %17 : i32 to vector<16x1xi32>
      %20 = arith.addi %19, %18 : vector<16x1xi32>
      %c15_i32 = arith.constant 15 : i32
      %21 = vector.broadcast %c15_i32 : i32 to vector<16x1xi32>
      %22 = arith.cmpi sle, %20, %21 : vector<16x1xi32>
      %c0_i32_8 = arith.constant 0 : i32
      %23 = arith.sitofp %c0_i32_8 : i32 to f32
      %24 = vector.shape_cast %22 : vector<16x1xi1> to vector<16x1xi1>
      %25 = vector.broadcast %24 : vector<16x1xi1> to vector<16x128xi1>
      %26 = vector.broadcast %23 : f32 to vector<16x128xf32>
      %27 = arith.select %25, %15, %26 : vector<16x128xi1>, vector<16x128xf32>
      %c15_i32_9 = arith.constant 15 : i32
      %28 = vector.broadcast %c15_i32_9 : i32 to vector<16x1xi32>
      %29 = arith.cmpi sle, %20, %28 : vector<16x1xi32>
      %c0_i32_10 = arith.constant 0 : i32
      %30 = arith.sitofp %c0_i32_10 : i32 to f32
      %31 = vector.shape_cast %29 : vector<16x1xi1> to vector<16x1xi1>
      %32 = vector.broadcast %31 : vector<16x1xi1> to vector<16x128xi1>
      %33 = vector.broadcast %30 : f32 to vector<16x128xf32>
      %34 = arith.select %32, %16, %33 : vector<16x128xi1>, vector<16x128xf32>
      %c0_11 = arith.constant 0 : index
      %c0_12 = arith.constant 0 : index
      %35 = vector.load %arg4[%c0_11, %c0_12] : memref<128x256xf32, #tpu.memory_space<vmem>>, vector<128x256xf32>
      %cst_13 = arith.constant dense<0.000000e+00> : vector<16x256xf32>
      %36 = tpu.matmul %27, %35, %cst_13 {dimension_numbers = #tpu.dot_dimension_numbers<[1], [0], [0], [1], [0, 0, 1, 1], [], []>} : vector<16x128xf32>, vector<128x256xf32>, vector<16x256xf32> -> vector<16x256xf32>
      %c0_14 = arith.constant 0 : index
      %c0_15 = arith.constant 0 : index
      %37 = vector.load %arg5[%c0_14, %c0_15] : memref<128x256xf32, #tpu.memory_space<vmem>>, vector<128x256xf32>
      %cst_16 = arith.constant dense<0.000000e+00> : vector<16x256xf32>
      %38 = tpu.matmul %34, %37, %cst_16 {dimension_numbers = #tpu.dot_dimension_numbers<[1], [0], [0], [1], [0, 0, 1, 1], [], []>} : vector<16x128xf32>, vector<128x256xf32>, vector<16x256xf32> -> vector<16x256xf32>
      %39 = arith.addf %36, %38 : vector<16x256xf32>
      %c0_17 = arith.constant 0 : index
      %c0_18 = arith.constant 0 : index
      %40 = vector.load %arg3[%c0_17, %c0_18] : memref<128x256xf32, #tpu.memory_space<vmem>>, vector<128x256xf32>
      %cst_19 = arith.constant dense<0.000000e+00> : vector<16x256xf32>
      %41 = tpu.matmul %34, %40, %cst_19 {dimension_numbers = #tpu.dot_dimension_numbers<[1], [0], [0], [1], [0, 0, 1, 1], [], []>} : vector<16x128xf32>, vector<128x256xf32>, vector<16x256xf32> -> vector<16x256xf32>
      %c0_20 = arith.constant 0 : index
      %c0_21 = arith.constant 0 : index
      %c0_22 = arith.constant 0 : index
      %42 = vector.load %arg2[%c0_20, %c0_21, %c0_22] : memref<1x1x256xf32, #tpu.memory_space<vmem>>, vector<1x1x256xf32>
      %43 = vector.shape_cast %42 : vector<1x1x256xf32> to vector<1x256xf32>
      %44 = vector.extract_strided_slice %41 {offsets = [0, 0], sizes = [15, 256], strides = [1, 1]} : vector<16x256xf32> to vector<15x256xf32>
      %45 = tpu.concatenate %43, %44 in 0 : vector<1x256xf32>, vector<15x256xf32> -> vector<16x256xf32>
      %46 = arith.addf %39, %45 : vector<16x256xf32>
      %c16_i32_23 = arith.constant 16 : i32
      %47 = arith.muli %arg0, %c16_i32_23 : i32
      %48 = tpu.iota {dimensions = array<i32: 0>} : vector<16x1xi32>
      %49 = vector.broadcast %47 : i32 to vector<16x1xi32>
      %50 = arith.addi %49, %48 : vector<16x1xi32>
      %c16_i32_24 = arith.constant 16 : i32
      %51 = vector.broadcast %c16_i32_24 : i32 to vector<16x1xi32>
      %52 = arith.cmpi slt, %50, %51 : vector<16x1xi32>
      %cst_25 = arith.constant 0.000000e+00 : f32
      %53 = vector.shape_cast %52 : vector<16x1xi1> to vector<16x1xi1>
      %54 = vector.broadcast %53 : vector<16x1xi1> to vector<16x256xi1>
      %55 = vector.broadcast %cst_25 : f32 to vector<16x256xf32>
      %56 = arith.select %54, %46, %55 : vector<16x256xi1>, vector<16x256xf32>
      %c0_26 = arith.constant 0 : index
      %c0_27 = arith.constant 0 : index
      %57 = vector.load %arg8[%c0_26, %c0_27] : memref<16x256xf32, #tpu.memory_space<vmem>>, vector<16x256xf32>
      tpu.vector_store %arg8[%c0_26, %c0_27], %56 {strides = array<i32>} : memref<16x256xf32, #tpu.memory_space<vmem>>, vector<16x256xf32>,
      %cst_28 = arith.constant dense<0.000000e+00> : vector<256xf32>
      %58 = vector.multi_reduction <add>, %56, %cst_28 [0] : vector<16x256xf32> to vector<256xf32>
      %59 = vector.shape_cast %58 : vector<256xf32> to vector<1x256xf32>
      %c0_29 = arith.constant 0 : index
      %c0_30 = arith.constant 0 : index
      %c0_31 = arith.constant 0 : index
      %60 = vector.load %arg9[%c0_29, %c0_30, %c0_31] : memref<1x2x256xf32, #tpu.memory_space<vmem>>, vector<1x1x256xf32>
      %61 = vector.shape_cast %60 : vector<1x1x256xf32> to vector<1x256xf32>
      %62 = vector.shape_cast %59 : vector<1x256xf32> to vector<1x1x256xf32>
      tpu.vector_store %arg9[%c0_29, %c0_30, %c0_31], %62 {strides = array<i32>} : memref<1x2x256xf32, #tpu.memory_space<vmem>>, vector<1x1x256xf32>,
      %63 = arith.mulf %56, %56 : vector<16x256xf32>
      %cst_32 = arith.constant dense<0.000000e+00> : vector<256xf32>
      %64 = vector.multi_reduction <add>, %63, %cst_32 [0] : vector<16x256xf32> to vector<256xf32>
      %65 = vector.shape_cast %64 : vector<256xf32> to vector<1x256xf32>
      %c0_33 = arith.constant 0 : index
      %c1 = arith.constant 1 : index
      %c0_34 = arith.constant 0 : index
      %66 = vector.load %arg9[%c0_33, %c1, %c0_34] : memref<1x2x256xf32, #tpu.memory_space<vmem>>, vector<1x1x256xf32>
      %67 = vector.shape_cast %66 : vector<1x1x256xf32> to vector<1x256xf32>
      %68 = vector.shape_cast %65 : vector<1x256xf32> to vector<1x1x256xf32>
      tpu.vector_store %arg9[%c0_33, %c1, %c0_34], %68 {strides = array<i32>} : memref<1x2x256xf32, #tpu.memory_space<vmem>>, vector<1x1x256xf32>,
    } else {
    }
    return
  }
  func.func @transform_0(%arg0: i32) -> (i32, i32) {
    %c0_i32 = arith.constant 0 : i32
    %c0_i32_0 = arith.constant 0 : i32
    return %arg0, %c0_i32 : i32, i32
  }
  func.func @transform_1(%arg0: i32) -> (i32, i32, i32) {
    %c0_i32 = arith.constant 0 : i32
    %c0_i32_0 = arith.constant 0 : i32
    %c0_i32_1 = arith.constant 0 : i32
    return %arg0, %c0_i32, %c0_i32_0 : i32, i32, i32
  }
  func.func @transform_2(%arg0: i32) -> (i32, i32) {
    %c0_i32 = arith.constant 0 : i32
    %c0_i32_0 = arith.constant 0 : i32
    %c0_i32_1 = arith.constant 0 : i32
    return %c0_i32, %c0_i32_0 : i32, i32
  }
  func.func @transform_3(%arg0: i32) -> (i32, i32) {
    %c0_i32 = arith.constant 0 : i32
    %c0_i32_0 = arith.constant 0 : i32
    %c0_i32_1 = arith.constant 0 : i32
    return %c0_i32, %c0_i32_0 : i32, i32
  }
  func.func @transform_4(%arg0: i32) -> (i32, i32) {
    %c0_i32 = arith.constant 0 : i32
    %c0_i32_0 = arith.constant 0 : i32
    %c0_i32_1 = arith.constant 0 : i32
    return %c0_i32, %c0_i32_0 : i32, i32
  }
  func.func @transform_5(%arg0: i32) -> (i32, i32) {
    %c0_i32 = arith.constant 0 : i32
    %c0_i32_0 = arith.constant 0 : i32
    %c0_i32_1 = arith.constant 0 : i32
    return %c0_i32, %c0_i32_0 : i32, i32
  }
  func.func @transform_6(%arg0: i32) -> (i32, i32) {
    %c0_i32 = arith.constant 0 : i32
    %c0_i32_0 = arith.constant 0 : i32
    %c0_i32_1 = arith.constant 0 : i32
    return %c0_i32, %c0_i32_0 : i32, i32
  }
  func.func @transform_7(%arg0: i32) -> (i32, i32) {
    %c0_i32 = arith.constant 0 : i32
    %c0_i32_0 = arith.constant 0 : i32
    return %arg0, %c0_i32 : i32, i32
  }
  func.func @transform_8(%arg0: i32) -> (i32, i32, i32) {
    %c0_i32 = arith.constant 0 : i32
    %c0_i32_0 = arith.constant 0 : i32
    %c0_i32_1 = arith.constant 0 : i32
    return %arg0, %c0_i32, %c0_i32_0 : i32, i32, i32
  }
}

module attributes {stable_mosaic.version = 11 : i64} {
  func.func @_head_kernel(%arg0: i32, %arg1: memref<8x128xf32, #tpu.memory_space<vmem>>, %arg2: memref<1x128xf32, #tpu.memory_space<vmem>>, %arg3: memref<1x128xf32, #tpu.memory_space<vmem>>, %arg4: memref<128x128xf32, #tpu.memory_space<vmem>>, %arg5: memref<1x128xf32, #tpu.memory_space<vmem>>, %arg6: memref<8x128xf32, #tpu.memory_space<vmem>>) attributes {dimension_semantics = [#tpu.dimension_semantics<parallel>], iteration_bounds = array<i64: 1>, scalar_prefetch = 0 : i64, scratch_operands = 0 : i64, tpu.core_type = #tpu.core_type<tc>, window_params = [{transform_indices = @transform_0, window_bounds = array<i64: 8, 128>}, {pipeline_mode = #tpu.pipeline_mode<synchronous>, transform_indices = @transform_1, window_bounds = array<i64: 1, 128>}, {pipeline_mode = #tpu.pipeline_mode<synchronous>, transform_indices = @transform_2, window_bounds = array<i64: 1, 128>}, {pipeline_mode = #tpu.pipeline_mode<synchronous>, transform_indices = @transform_3, window_bounds = array<i64: 128, 128>}, {pipeline_mode = #tpu.pipeline_mode<synchronous>, transform_indices = @transform_4, window_bounds = array<i64: 1, 128>}, {transform_indices = @transform_5, window_bounds = array<i64: 8, 128>}]} {
    %c0 = arith.constant 0 : index
    %c0_0 = arith.constant 0 : index
    %0 = vector.load %arg1[%c0, %c0_0] : memref<8x128xf32, #tpu.memory_space<vmem>>, vector<8x128xf32>
    %c0_1 = arith.constant 0 : index
    %c0_2 = arith.constant 0 : index
    %1 = vector.load %arg2[%c0_1, %c0_2] : memref<1x128xf32, #tpu.memory_space<vmem>>, vector<1x128xf32>
    %2 = vector.broadcast %1 : vector<1x128xf32> to vector<8x128xf32>
    %3 = arith.mulf %0, %2 : vector<8x128xf32>
    %c0_3 = arith.constant 0 : index
    %c0_4 = arith.constant 0 : index
    %4 = vector.load %arg3[%c0_3, %c0_4] : memref<1x128xf32, #tpu.memory_space<vmem>>, vector<1x128xf32>
    %5 = vector.broadcast %4 : vector<1x128xf32> to vector<8x128xf32>
    %6 = arith.addf %3, %5 : vector<8x128xf32>
    %cst = arith.constant 0.000000e+00 : f32
    %7 = vector.broadcast %cst : f32 to vector<8x128xf32>
    %8 = arith.maximumf %6, %7 : vector<8x128xf32>
    %c0_5 = arith.constant 0 : index
    %c0_6 = arith.constant 0 : index
    %9 = vector.load %arg4[%c0_5, %c0_6] : memref<128x128xf32, #tpu.memory_space<vmem>>, vector<128x128xf32>
    %cst_7 = arith.constant dense<0.000000e+00> : vector<8x128xf32>
    %10 = tpu.matmul %8, %9, %cst_7 {dimension_numbers = #tpu.dot_dimension_numbers<[1], [0], [0], [1], [0, 0, 1, 1], [], []>} : vector<8x128xf32>, vector<128x128xf32>, vector<8x128xf32> -> vector<8x128xf32>
    %c0_8 = arith.constant 0 : index
    %c0_9 = arith.constant 0 : index
    %11 = vector.load %arg5[%c0_8, %c0_9] : memref<1x128xf32, #tpu.memory_space<vmem>>, vector<1x128xf32>
    %12 = vector.broadcast %11 : vector<1x128xf32> to vector<8x128xf32>
    %13 = arith.addf %10, %12 : vector<8x128xf32>
    %c0_10 = arith.constant 0 : index
    %c0_11 = arith.constant 0 : index
    %14 = vector.load %arg6[%c0_10, %c0_11] : memref<8x128xf32, #tpu.memory_space<vmem>>, vector<8x128xf32>
    tpu.vector_store %arg6[%c0_10, %c0_11], %13 {strides = array<i32>} : memref<8x128xf32, #tpu.memory_space<vmem>>, vector<8x128xf32>,
    return
  }
  func.func @transform_0(%arg0: i32) -> (i32, i32) {
    %c0_i32 = arith.constant 0 : i32
    %c0_i32_0 = arith.constant 0 : i32
    return %arg0, %c0_i32 : i32, i32
  }
  func.func @transform_1(%arg0: i32) -> (i32, i32) {
    %c0_i32 = arith.constant 0 : i32
    %c0_i32_0 = arith.constant 0 : i32
    %c0_i32_1 = arith.constant 0 : i32
    return %c0_i32, %c0_i32_0 : i32, i32
  }
  func.func @transform_2(%arg0: i32) -> (i32, i32) {
    %c0_i32 = arith.constant 0 : i32
    %c0_i32_0 = arith.constant 0 : i32
    %c0_i32_1 = arith.constant 0 : i32
    return %c0_i32, %c0_i32_0 : i32, i32
  }
  func.func @transform_3(%arg0: i32) -> (i32, i32) {
    %c0_i32 = arith.constant 0 : i32
    %c0_i32_0 = arith.constant 0 : i32
    %c0_i32_1 = arith.constant 0 : i32
    return %c0_i32, %c0_i32_0 : i32, i32
  }
  func.func @transform_4(%arg0: i32) -> (i32, i32) {
    %c0_i32 = arith.constant 0 : i32
    %c0_i32_0 = arith.constant 0 : i32
    %c0_i32_1 = arith.constant 0 : i32
    return %c0_i32, %c0_i32_0 : i32, i32
  }
  func.func @transform_5(%arg0: i32) -> (i32, i32) {
    %c0_i32 = arith.constant 0 : i32
    %c0_i32_0 = arith.constant 0 : i32
    return %arg0, %c0_i32 : i32, i32
  }
}

module attributes {stable_mosaic.version = 11 : i64} {
  func.func @_conv_stats_kernel(%arg0: i32, %arg1: memref<8x512xf32, #tpu.memory_space<vmem>>, %arg2: memref<1x1x128xf32, #tpu.memory_space<vmem>>, %arg3: memref<256x128xf32, #tpu.memory_space<vmem>>, %arg4: memref<256x128xf32, #tpu.memory_space<vmem>>, %arg5: memref<256x128xf32, #tpu.memory_space<vmem>>, %arg6: memref<1x512xf32, #tpu.memory_space<vmem>>, %arg7: memref<1x512xf32, #tpu.memory_space<vmem>>, %arg8: memref<8x128xf32, #tpu.memory_space<vmem>>, %arg9: memref<1x2x128xf32, #tpu.memory_space<vmem>>) attributes {dimension_semantics = [#tpu.dimension_semantics<parallel>], iteration_bounds = array<i64: 1>, scalar_prefetch = 0 : i64, scratch_operands = 0 : i64, tpu.core_type = #tpu.core_type<tc>, window_params = [{transform_indices = @transform_0, window_bounds = array<i64: 8, 512>}, {transform_indices = @transform_1, window_bounds = array<i64: 1, 1, 128>}, {pipeline_mode = #tpu.pipeline_mode<synchronous>, transform_indices = @transform_2, window_bounds = array<i64: 256, 128>}, {pipeline_mode = #tpu.pipeline_mode<synchronous>, transform_indices = @transform_3, window_bounds = array<i64: 256, 128>}, {pipeline_mode = #tpu.pipeline_mode<synchronous>, transform_indices = @transform_4, window_bounds = array<i64: 256, 128>}, {pipeline_mode = #tpu.pipeline_mode<synchronous>, transform_indices = @transform_5, window_bounds = array<i64: 1, 512>}, {pipeline_mode = #tpu.pipeline_mode<synchronous>, transform_indices = @transform_6, window_bounds = array<i64: 1, 512>}, {transform_indices = @transform_7, window_bounds = array<i64: 8, 128>}, {transform_indices = @transform_8, window_bounds = array<i64: 1, 2, 128>}]} {
    %c0_i32 = arith.constant 0 : i32
    %0 = arith.cmpi slt, %arg0, %c0_i32 : i32
    %1 = arith.extui %0 : i1 to i32
    %c0_i32_0 = arith.constant 0 : i32
    %2 = arith.cmpi ne, %1, %c0_i32_0 : i32
    scf.if %2 {
      %c0 = arith.constant 0 : index
      %c0_3 = arith.constant 0 : index
      %6 = vector.load %arg1[%c0, %c0_3] : memref<8x512xf32, #tpu.memory_space<vmem>>, vector<8x512xf32>
      %c0_4 = arith.constant 0 : index
      %c0_5 = arith.constant 0 : index
      %7 = vector.load %arg6[%c0_4, %c0_5] : memref<1x512xf32, #tpu.memory_space<vmem>>, vector<1x512xf32>
      %8 = vector.broadcast %7 : vector<1x512xf32> to vector<8x512xf32>
      %9 = arith.mulf %6, %8 : vector<8x512xf32>
      %c0_6 = arith.constant 0 : index
      %c0_7 = arith.constant 0 : index
      %10 = vector.load %arg7[%c0_6, %c0_7] : memref<1x512xf32, #tpu.memory_space<vmem>>, vector<1x512xf32>
      %11 = vector.broadcast %10 : vector<1x512xf32> to vector<8x512xf32>
      %12 = arith.addf %9, %11 : vector<8x512xf32>
      %cst = arith.constant 0.000000e+00 : f32
      %13 = vector.broadcast %cst : f32 to vector<8x512xf32>
      %14 = arith.maximumf %12, %13 : vector<8x512xf32>
      %15 = vector.extract_strided_slice %14 {offsets = [0, 0], sizes = [8, 256], strides = [1, 1]} : vector<8x512xf32> to vector<8x256xf32>
      %16 = vector.extract_strided_slice %14 {offsets = [0, 256], sizes = [8, 256], strides = [1, 1]} : vector<8x512xf32> to vector<8x256xf32>
      %c0_8 = arith.constant 0 : index
      %c0_9 = arith.constant 0 : index
      %17 = vector.load %arg4[%c0_8, %c0_9] : memref<256x128xf32, #tpu.memory_space<vmem>>, vector<256x128xf32>
      %cst_10 = arith.constant dense<0.000000e+00> : vector<8x128xf32>
      %18 = tpu.matmul %15, %17, %cst_10 {dimension_numbers = #tpu.dot_dimension_numbers<[1], [0], [0], [1], [0, 0, 1, 1], [], []>} : vector<8x256xf32>, vector<256x128xf32>, vector<8x128xf32> -> vector<8x128xf32>
      %c0_11 = arith.constant 0 : index
      %c0_12 = arith.constant 0 : index
      %19 = vector.load %arg5[%c0_11, %c0_12] : memref<256x128xf32, #tpu.memory_space<vmem>>, vector<256x128xf32>
      %cst_13 = arith.constant dense<0.000000e+00> : vector<8x128xf32>
      %20 = tpu.matmul %16, %19, %cst_13 {dimension_numbers = #tpu.dot_dimension_numbers<[1], [0], [0], [1], [0, 0, 1, 1], [], []>} : vector<8x256xf32>, vector<256x128xf32>, vector<8x128xf32> -> vector<8x128xf32>
      %21 = arith.addf %18, %20 : vector<8x128xf32>
      %c0_14 = arith.constant 0 : index
      %c0_15 = arith.constant 0 : index
      %22 = vector.load %arg3[%c0_14, %c0_15] : memref<256x128xf32, #tpu.memory_space<vmem>>, vector<256x128xf32>
      %cst_16 = arith.constant dense<0.000000e+00> : vector<8x128xf32>
      %23 = tpu.matmul %16, %22, %cst_16 {dimension_numbers = #tpu.dot_dimension_numbers<[1], [0], [0], [1], [0, 0, 1, 1], [], []>} : vector<8x256xf32>, vector<256x128xf32>, vector<8x128xf32> -> vector<8x128xf32>
      %c0_17 = arith.constant 0 : index
      %c0_18 = arith.constant 0 : index
      %c0_19 = arith.constant 0 : index
      %24 = vector.load %arg2[%c0_17, %c0_18, %c0_19] : memref<1x1x128xf32, #tpu.memory_space<vmem>>, vector<1x1x128xf32>
      %25 = vector.shape_cast %24 : vector<1x1x128xf32> to vector<1x128xf32>
      %26 = vector.extract_strided_slice %23 {offsets = [0, 0], sizes = [7, 128], strides = [1, 1]} : vector<8x128xf32> to vector<7x128xf32>
      %27 = tpu.concatenate %25, %26 in 0 : vector<1x128xf32>, vector<7x128xf32> -> vector<8x128xf32>
      %28 = arith.addf %21, %27 : vector<8x128xf32>
      %c0_20 = arith.constant 0 : index
      %c0_21 = arith.constant 0 : index
      %29 = vector.load %arg8[%c0_20, %c0_21] : memref<8x128xf32, #tpu.memory_space<vmem>>, vector<8x128xf32>
      tpu.vector_store %arg8[%c0_20, %c0_21], %28 {strides = array<i32>} : memref<8x128xf32, #tpu.memory_space<vmem>>, vector<8x128xf32>,
      %cst_22 = arith.constant dense<0.000000e+00> : vector<128xf32>
      %30 = vector.multi_reduction <add>, %28, %cst_22 [0] : vector<8x128xf32> to vector<128xf32>
      %31 = vector.shape_cast %30 : vector<128xf32> to vector<1x128xf32>
      %c0_23 = arith.constant 0 : index
      %c0_24 = arith.constant 0 : index
      %c0_25 = arith.constant 0 : index
      %32 = vector.load %arg9[%c0_23, %c0_24, %c0_25] : memref<1x2x128xf32, #tpu.memory_space<vmem>>, vector<1x1x128xf32>
      %33 = vector.shape_cast %32 : vector<1x1x128xf32> to vector<1x128xf32>
      %34 = vector.shape_cast %31 : vector<1x128xf32> to vector<1x1x128xf32>
      tpu.vector_store %arg9[%c0_23, %c0_24, %c0_25], %34 {strides = array<i32>} : memref<1x2x128xf32, #tpu.memory_space<vmem>>, vector<1x1x128xf32>,
      %35 = arith.mulf %28, %28 : vector<8x128xf32>
      %cst_26 = arith.constant dense<0.000000e+00> : vector<128xf32>
      %36 = vector.multi_reduction <add>, %35, %cst_26 [0] : vector<8x128xf32> to vector<128xf32>
      %37 = vector.shape_cast %36 : vector<128xf32> to vector<1x128xf32>
      %c0_27 = arith.constant 0 : index
      %c1 = arith.constant 1 : index
      %c0_28 = arith.constant 0 : index
      %38 = vector.load %arg9[%c0_27, %c1, %c0_28] : memref<1x2x128xf32, #tpu.memory_space<vmem>>, vector<1x1x128xf32>
      %39 = vector.shape_cast %38 : vector<1x1x128xf32> to vector<1x128xf32>
      %40 = vector.shape_cast %37 : vector<1x128xf32> to vector<1x1x128xf32>
      tpu.vector_store %arg9[%c0_27, %c1, %c0_28], %40 {strides = array<i32>} : memref<1x2x128xf32, #tpu.memory_space<vmem>>, vector<1x1x128xf32>,
    } else {
    }
    %c0_i32_1 = arith.constant 0 : i32
    %3 = arith.cmpi eq, %arg0, %c0_i32_1 : i32
    %4 = arith.extui %3 : i1 to i32
    %c0_i32_2 = arith.constant 0 : i32
    %5 = arith.cmpi ne, %4, %c0_i32_2 : i32
    scf.if %5 {
      %c0 = arith.constant 0 : index
      %c0_3 = arith.constant 0 : index
      %6 = vector.load %arg1[%c0, %c0_3] : memref<8x512xf32, #tpu.memory_space<vmem>>, vector<8x512xf32>
      %c0_4 = arith.constant 0 : index
      %c0_5 = arith.constant 0 : index
      %7 = vector.load %arg6[%c0_4, %c0_5] : memref<1x512xf32, #tpu.memory_space<vmem>>, vector<1x512xf32>
      %8 = vector.broadcast %7 : vector<1x512xf32> to vector<8x512xf32>
      %9 = arith.mulf %6, %8 : vector<8x512xf32>
      %c0_6 = arith.constant 0 : index
      %c0_7 = arith.constant 0 : index
      %10 = vector.load %arg7[%c0_6, %c0_7] : memref<1x512xf32, #tpu.memory_space<vmem>>, vector<1x512xf32>
      %11 = vector.broadcast %10 : vector<1x512xf32> to vector<8x512xf32>
      %12 = arith.addf %9, %11 : vector<8x512xf32>
      %cst = arith.constant 0.000000e+00 : f32
      %13 = vector.broadcast %cst : f32 to vector<8x512xf32>
      %14 = arith.maximumf %12, %13 : vector<8x512xf32>
      %15 = vector.extract_strided_slice %14 {offsets = [0, 0], sizes = [8, 256], strides = [1, 1]} : vector<8x512xf32> to vector<8x256xf32>
      %16 = vector.extract_strided_slice %14 {offsets = [0, 256], sizes = [8, 256], strides = [1, 1]} : vector<8x512xf32> to vector<8x256xf32>
      %c8_i32 = arith.constant 8 : i32
      %17 = arith.muli %arg0, %c8_i32 : i32
      %18 = tpu.iota {dimensions = array<i32: 0>} : vector<8x1xi32>
      %19 = vector.broadcast %17 : i32 to vector<8x1xi32>
      %20 = arith.addi %19, %18 : vector<8x1xi32>
      %c7_i32 = arith.constant 7 : i32
      %21 = vector.broadcast %c7_i32 : i32 to vector<8x1xi32>
      %22 = arith.cmpi sle, %20, %21 : vector<8x1xi32>
      %c0_i32_8 = arith.constant 0 : i32
      %23 = arith.sitofp %c0_i32_8 : i32 to f32
      %24 = vector.shape_cast %22 : vector<8x1xi1> to vector<8x1xi1>
      %25 = vector.broadcast %24 : vector<8x1xi1> to vector<8x256xi1>
      %26 = vector.broadcast %23 : f32 to vector<8x256xf32>
      %27 = arith.select %25, %15, %26 : vector<8x256xi1>, vector<8x256xf32>
      %c7_i32_9 = arith.constant 7 : i32
      %28 = vector.broadcast %c7_i32_9 : i32 to vector<8x1xi32>
      %29 = arith.cmpi sle, %20, %28 : vector<8x1xi32>
      %c0_i32_10 = arith.constant 0 : i32
      %30 = arith.sitofp %c0_i32_10 : i32 to f32
      %31 = vector.shape_cast %29 : vector<8x1xi1> to vector<8x1xi1>
      %32 = vector.broadcast %31 : vector<8x1xi1> to vector<8x256xi1>
      %33 = vector.broadcast %30 : f32 to vector<8x256xf32>
      %34 = arith.select %32, %16, %33 : vector<8x256xi1>, vector<8x256xf32>
      %c0_11 = arith.constant 0 : index
      %c0_12 = arith.constant 0 : index
      %35 = vector.load %arg4[%c0_11, %c0_12] : memref<256x128xf32, #tpu.memory_space<vmem>>, vector<256x128xf32>
      %cst_13 = arith.constant dense<0.000000e+00> : vector<8x128xf32>
      %36 = tpu.matmul %27, %35, %cst_13 {dimension_numbers = #tpu.dot_dimension_numbers<[1], [0], [0], [1], [0, 0, 1, 1], [], []>} : vector<8x256xf32>, vector<256x128xf32>, vector<8x128xf32> -> vector<8x128xf32>
      %c0_14 = arith.constant 0 : index
      %c0_15 = arith.constant 0 : index
      %37 = vector.load %arg5[%c0_14, %c0_15] : memref<256x128xf32, #tpu.memory_space<vmem>>, vector<256x128xf32>
      %cst_16 = arith.constant dense<0.000000e+00> : vector<8x128xf32>
      %38 = tpu.matmul %34, %37, %cst_16 {dimension_numbers = #tpu.dot_dimension_numbers<[1], [0], [0], [1], [0, 0, 1, 1], [], []>} : vector<8x256xf32>, vector<256x128xf32>, vector<8x128xf32> -> vector<8x128xf32>
      %39 = arith.addf %36, %38 : vector<8x128xf32>
      %c0_17 = arith.constant 0 : index
      %c0_18 = arith.constant 0 : index
      %40 = vector.load %arg3[%c0_17, %c0_18] : memref<256x128xf32, #tpu.memory_space<vmem>>, vector<256x128xf32>
      %cst_19 = arith.constant dense<0.000000e+00> : vector<8x128xf32>
      %41 = tpu.matmul %34, %40, %cst_19 {dimension_numbers = #tpu.dot_dimension_numbers<[1], [0], [0], [1], [0, 0, 1, 1], [], []>} : vector<8x256xf32>, vector<256x128xf32>, vector<8x128xf32> -> vector<8x128xf32>
      %c0_20 = arith.constant 0 : index
      %c0_21 = arith.constant 0 : index
      %c0_22 = arith.constant 0 : index
      %42 = vector.load %arg2[%c0_20, %c0_21, %c0_22] : memref<1x1x128xf32, #tpu.memory_space<vmem>>, vector<1x1x128xf32>
      %43 = vector.shape_cast %42 : vector<1x1x128xf32> to vector<1x128xf32>
      %44 = vector.extract_strided_slice %41 {offsets = [0, 0], sizes = [7, 128], strides = [1, 1]} : vector<8x128xf32> to vector<7x128xf32>
      %45 = tpu.concatenate %43, %44 in 0 : vector<1x128xf32>, vector<7x128xf32> -> vector<8x128xf32>
      %46 = arith.addf %39, %45 : vector<8x128xf32>
      %c8_i32_23 = arith.constant 8 : i32
      %47 = arith.muli %arg0, %c8_i32_23 : i32
      %48 = tpu.iota {dimensions = array<i32: 0>} : vector<8x1xi32>
      %49 = vector.broadcast %47 : i32 to vector<8x1xi32>
      %50 = arith.addi %49, %48 : vector<8x1xi32>
      %c8_i32_24 = arith.constant 8 : i32
      %51 = vector.broadcast %c8_i32_24 : i32 to vector<8x1xi32>
      %52 = arith.cmpi slt, %50, %51 : vector<8x1xi32>
      %cst_25 = arith.constant 0.000000e+00 : f32
      %53 = vector.shape_cast %52 : vector<8x1xi1> to vector<8x1xi1>
      %54 = vector.broadcast %53 : vector<8x1xi1> to vector<8x128xi1>
      %55 = vector.broadcast %cst_25 : f32 to vector<8x128xf32>
      %56 = arith.select %54, %46, %55 : vector<8x128xi1>, vector<8x128xf32>
      %c0_26 = arith.constant 0 : index
      %c0_27 = arith.constant 0 : index
      %57 = vector.load %arg8[%c0_26, %c0_27] : memref<8x128xf32, #tpu.memory_space<vmem>>, vector<8x128xf32>
      tpu.vector_store %arg8[%c0_26, %c0_27], %56 {strides = array<i32>} : memref<8x128xf32, #tpu.memory_space<vmem>>, vector<8x128xf32>,
      %cst_28 = arith.constant dense<0.000000e+00> : vector<128xf32>
      %58 = vector.multi_reduction <add>, %56, %cst_28 [0] : vector<8x128xf32> to vector<128xf32>
      %59 = vector.shape_cast %58 : vector<128xf32> to vector<1x128xf32>
      %c0_29 = arith.constant 0 : index
      %c0_30 = arith.constant 0 : index
      %c0_31 = arith.constant 0 : index
      %60 = vector.load %arg9[%c0_29, %c0_30, %c0_31] : memref<1x2x128xf32, #tpu.memory_space<vmem>>, vector<1x1x128xf32>
      %61 = vector.shape_cast %60 : vector<1x1x128xf32> to vector<1x128xf32>
      %62 = vector.shape_cast %59 : vector<1x128xf32> to vector<1x1x128xf32>
      tpu.vector_store %arg9[%c0_29, %c0_30, %c0_31], %62 {strides = array<i32>} : memref<1x2x128xf32, #tpu.memory_space<vmem>>, vector<1x1x128xf32>,
      %63 = arith.mulf %56, %56 : vector<8x128xf32>
      %cst_32 = arith.constant dense<0.000000e+00> : vector<128xf32>
      %64 = vector.multi_reduction <add>, %63, %cst_32 [0] : vector<8x128xf32> to vector<128xf32>
      %65 = vector.shape_cast %64 : vector<128xf32> to vector<1x128xf32>
      %c0_33 = arith.constant 0 : index
      %c1 = arith.constant 1 : index
      %c0_34 = arith.constant 0 : index
      %66 = vector.load %arg9[%c0_33, %c1, %c0_34] : memref<1x2x128xf32, #tpu.memory_space<vmem>>, vector<1x1x128xf32>
      %67 = vector.shape_cast %66 : vector<1x1x128xf32> to vector<1x128xf32>
      %68 = vector.shape_cast %65 : vector<1x128xf32> to vector<1x1x128xf32>
      tpu.vector_store %arg9[%c0_33, %c1, %c0_34], %68 {strides = array<i32>} : memref<1x2x128xf32, #tpu.memory_space<vmem>>, vector<1x1x128xf32>,
    } else {
    }
    return
  }
  func.func @transform_0(%arg0: i32) -> (i32, i32) {
    %c0_i32 = arith.constant 0 : i32
    %c0_i32_0 = arith.constant 0 : i32
    return %arg0, %c0_i32 : i32, i32
  }
  func.func @transform_1(%arg0: i32) -> (i32, i32, i32) {
    %c0_i32 = arith.constant 0 : i32
    %c0_i32_0 = arith.constant 0 : i32
    %c0_i32_1 = arith.constant 0 : i32
    return %arg0, %c0_i32, %c0_i32_0 : i32, i32, i32
  }
  func.func @transform_2(%arg0: i32) -> (i32, i32) {
    %c0_i32 = arith.constant 0 : i32
    %c0_i32_0 = arith.constant 0 : i32
    %c0_i32_1 = arith.constant 0 : i32
    return %c0_i32, %c0_i32_0 : i32, i32
  }
  func.func @transform_3(%arg0: i32) -> (i32, i32) {
    %c0_i32 = arith.constant 0 : i32
    %c0_i32_0 = arith.constant 0 : i32
    %c0_i32_1 = arith.constant 0 : i32
    return %c0_i32, %c0_i32_0 : i32, i32
  }
  func.func @transform_4(%arg0: i32) -> (i32, i32) {
    %c0_i32 = arith.constant 0 : i32
    %c0_i32_0 = arith.constant 0 : i32
    %c0_i32_1 = arith.constant 0 : i32
    return %c0_i32, %c0_i32_0 : i32, i32
  }
  func.func @transform_5(%arg0: i32) -> (i32, i32) {
    %c0_i32 = arith.constant 0 : i32
    %c0_i32_0 = arith.constant 0 : i32
    %c0_i32_1 = arith.constant 0 : i32
    return %c0_i32, %c0_i32_0 : i32, i32
  }
  func.func @transform_6(%arg0: i32) -> (i32, i32) {
    %c0_i32 = arith.constant 0 : i32
    %c0_i32_0 = arith.constant 0 : i32
    %c0_i32_1 = arith.constant 0 : i32
    return %c0_i32, %c0_i32_0 : i32, i32
  }
  func.func @transform_7(%arg0: i32) -> (i32, i32) {
    %c0_i32 = arith.constant 0 : i32
    %c0_i32_0 = arith.constant 0 : i32
    return %arg0, %c0_i32 : i32, i32
  }
  func.func @transform_8(%arg0: i32) -> (i32, i32, i32) {
    %c0_i32 = arith.constant 0 : i32
    %c0_i32_0 = arith.constant 0 : i32
    %c0_i32_1 = arith.constant 0 : i32
    return %arg0, %c0_i32, %c0_i32_0 : i32, i32, i32
  }
}

</mosaic_0001>

<bundles_post_ra>
// kernel: _lambda_.4
= control target key start
LH: loop header
LB: loop body
LE: loop exit
PB: predicated region body
PF: predicated region fallthrough
CT: control target
= control target key end

     0   :  { %vm371_vm0 = vcmask 1040384   ;;  %s695_s2 = inlined_call_operand.vmem [shape: f32[128,128], index: 2, kind: input, shape index: {}]   ;;  %s696_s4 = inlined_call_operand.vmem [shape: f32[128,128], index: 4, kind: input, shape index: {}]   ;;  %s697_s3 = inlined_call_operand.vmem [shape: f32[128,128], index: 3, kind: input, shape index: {}]   ;;  %s698_s0 = inlined_call_operand.vmem [shape: f32[32,256], index: 0, kind: input, shape index: {}]   ;;  %s699_s1 = inlined_call_operand.vmem [shape: f32[1,1,128], index: 1, kind: input, shape index: {}]   ;;  %s700_s5 = inlined_call_operand.vmem [shape: f32[32,128], index: 5, kind: output, shape index: {0}]   ;;  %s701_s6 = inlined_call_operand.vmem [shape: f32[1,2,128], index: 6, kind: output, shape index: {1}]  }
   0x1   :  { %v336_v0 = vld [vmem:[%s695_s2 + $0x78] sm:$0xff]  ;;  %v335_v1 = vld [vmem:[%s695_s2 + $0x70] sm:$0xff]  ;;  %v334_v4 = vld [vmem:[%s695_s2 + $0x68] sm:$0xff] }
   0x2   :  { %337 = vmatpush.msra.mxu2 %v336_v0  ;;  %v262_v2 = vld [vmem:[%s696_s4 + $0x78] sm:$0xff]  ;;  %v261_v5 = vld [vmem:[%s696_s4 + $0x70] sm:$0xff]  ;;  %v260_v7 = vld [vmem:[%s696_s4 + $0x68] sm:$0xff] }
   0x3   :  { %v246_v3 = vld [vmem:[%s697_s3 + $0x78] sm:$0xff]  ;;  %263 = vmatpush.msra.mxu0 %v262_v2  ;;  %v245_v6 = vld [vmem:[%s697_s3 + $0x70] sm:$0xff]  ;;  %451 = vmatpush.msra.mxu3 %v262_v2  ;;  %v244_v8 = vld [vmem:[%s697_s3 + $0x68] sm:$0xff] }
   0x4   :  { %292 = vmatpush.msra.mxu1 %v246_v3  ;;  %338 = vmatpush.msra.mxu2 %v335_v1  ;;  %v333_v9 = vld [vmem:[%s695_s2 + $0x60] sm:$0xff]  ;;  %v332_v12 = vld [vmem:[%s695_s2 + $0x58] sm:$0xff]  ;;  %v331_v15 = vld [vmem:[%s695_s2 + $0x50] sm:$0xff] }
   0x5   :  { %264 = vmatpush.msra.mxu0 %v261_v5  ;;  %452 = vmatpush.msra.mxu3 %v261_v5  ;;  %v259_v10 = vld [vmem:[%s696_s4 + $0x60] sm:$0xff]  ;;  %v258_v13 = vld [vmem:[%s696_s4 + $0x58] sm:$0xff]  ;;  %v257_v16 = vld [vmem:[%s696_s4 + $0x50] sm:$0xff] }
   0x6   :  { %293 = vmatpush.msra.mxu1 %v245_v6  ;;  %339 = vmatpush.msra.mxu2 %v334_v4  ;;  %v243_v11 = vld [vmem:[%s697_s3 + $0x60] sm:$0xff]  ;;  %v242_v14 = vld [vmem:[%s697_s3 + $0x58] sm:$0xff]  ;;  %v241_v17 = vld [vmem:[%s697_s3 + $0x50] sm:$0xff] }
   0x7   :  { %265 = vmatpush.msra.mxu0 %v260_v7  ;;  %453 = vmatpush.msra.mxu3 %v260_v7  ;;  %v330_v18 = vld [vmem:[%s695_s2 + $0x48] sm:$0xff]  ;;  %v329_v21 = vld [vmem:[%s695_s2 + $0x40] sm:$0xff]  ;;  %v328_v24 = vld [vmem:[%s695_s2 + $0x38] sm:$0xff] }
   0x8   :  { %294 = vmatpush.msra.mxu1 %v244_v8  ;;  %340 = vmatpush.msra.mxu2 %v333_v9  ;;  %v256_v19 = vld [vmem:[%s696_s4 + $0x48] sm:$0xff]  ;;  %v255_v22 = vld [vmem:[%s696_s4 + $0x40] sm:$0xff]  ;;  %v254_v25 = vld [vmem:[%s696_s4 + $0x38] sm:$0xff] }
   0x9   :  { %266 = vmatpush.msra.mxu0 %v259_v10  ;;  %454 = vmatpush.msra.mxu3 %v259_v10  ;;  %v240_v20 = vld [vmem:[%s697_s3 + $0x48] sm:$0xff]  ;;  %v239_v23 = vld [vmem:[%s697_s3 + $0x40] sm:$0xff]  ;;  %v238_v26 = vld [vmem:[%s697_s3 + $0x38] sm:$0xff] }
   0xa   :  { %295 = vmatpush.msra.mxu1 %v243_v11  ;;  %341 = vmatpush.msra.mxu2 %v332_v12  ;;  %v327_v27 = vld [vmem:[%s695_s2 + $0x30] sm:$0xff]  ;;  %v326_v30 = vld [vmem:[%s695_s2 + $0x28] sm:$0xff]  ;;  %v325_v33 = vld [vmem:[%s695_s2 + $0x20] sm:$0xff] }
   0xb   :  { %267 = vmatpush.msra.mxu0 %v258_v13  ;;  %455 = vmatpush.msra.mxu3 %v258_v13  ;;  %v253_v28 = vld [vmem:[%s696_s4 + $0x30] sm:$0xff]  ;;  %v252_v31 = vld [vmem:[%s696_s4 + $0x28] sm:$0xff]  ;;  %v251_v34 = vld [vmem:[%s696_s4 + $0x20] sm:$0xff] }
   0xc   :  { %296 = vmatpush.msra.mxu1 %v242_v14  ;;  %342 = vmatpush.msra.mxu2 %v331_v15  ;;  %v237_v29 = vld [vmem:[%s697_s3 + $0x30] sm:$0xff]  ;;  %v236_v32 = vld [vmem:[%s697_s3 + $0x28] sm:$0xff]  ;;  %v235_v35 = vld [vmem:[%s697_s3 + $0x20] sm:$0xff] }
   0xd   :  { %268 = vmatpush.msra.mxu0 %v257_v16  ;;  %456 = vmatpush.msra.mxu3 %v257_v16  ;;  %v324_v36 = vld [vmem:[%s695_s2 + $0x18] sm:$0xff]  ;;  %v323_v39 = vld [vmem:[%s695_s2 + $0x10] sm:$0xff]  ;;  %v322_v42 = vld [vmem:[%s695_s2 + $0x8] sm:$0xff] }
   0xe   :  { %297 = vmatpush.msra.mxu1 %v241_v17  ;;  %343 = vmatpush.msra.mxu2 %v330_v18  ;;  %v250_v37 = vld [vmem:[%s696_s4 + $0x18] sm:$0xff]  ;;  %v249_v40 = vld [vmem:[%s696_s4 + $0x10] sm:$0xff]  ;;  %v248_v43 = vld [vmem:[%s696_s4 + $0x8] sm:$0xff] }
   0xf   :  { %269 = vmatpush.msra.mxu0 %v256_v19  ;;  %457 = vmatpush.msra.mxu3 %v256_v19  ;;  %v234_v38 = vld [vmem:[%s697_s3 + $0x18] sm:$0xff]  ;;  %v233_v41 = vld [vmem:[%s697_s3 + $0x10] sm:$0xff]  ;;  %v232_v44 = vld [vmem:[%s697_s3 + $0x8] sm:$0xff] }
  0x10   :  { %298 = vmatpush.msra.mxu1 %v240_v20  ;;  %344 = vmatpush.msra.mxu2 %v329_v21  ;;  %v321_v45 = vld [vmem:[%s695_s2] sm:$0xff]  ;;  %v224_v46 = vld [vmem:[%s698_s0 + $0x8] sm:$0xff]  ;;  %v226_v50 = vld [vmem:[%s698_s0 + $0x18] sm:$0xff] }
  0x11   :  { %270 = vmatpush.msra.mxu0 %v255_v22  ;;  %458 = vmatpush.msra.mxu3 %v255_v22  ;;  %v247_v47 = vld [vmem:[%s696_s4] sm:$0xff]  ;;  %v225_v51 = vld [vmem:[%s698_s0 + $0x10] sm:$0xff]  ;;  %v228_v52 = vld [vmem:[%s698_s0 + $0x28] sm:$0xff] }
  0x12   :  { %299 = vmatpush.msra.mxu1 %v239_v23  ;;  %345 = vmatpush.msra.mxu2 %v328_v24  ;;  %v231_v48 = vld [vmem:[%s697_s3] sm:$0xff]  ;;  %v230_v54 = vld [vmem:[%s698_s0 + $0x38] sm:$0xff]  ;;  %v229_v55 = vld [vmem:[%s698_s0 + $0x30] sm:$0xff] }
  0x13   :  { %271 = vmatpush.msra.mxu0 %v254_v25  ;;  %459 = vmatpush.msra.mxu3 %v254_v25  ;;  %v223_v49 = vld [vmem:[%s698_s0] sm:$0xff] }
  0x14   :  { %300 = vmatpush.msra.mxu1 %v238_v26  ;;  %346 = vmatpush.msra.mxu2 %v327_v27  ;;  %v227_v53 = vld [vmem:[%s698_s0 + $0x20] sm:$0xff] }
  0x15   :  { %272 = vmatpush.msra.mxu0 %v253_v28  ;;  %460 = vmatpush.msra.mxu3 %v253_v28  ;;  %v366_v60 = vld [vmem:[%s699_s1] sm:$0x1] }
  0x16   :  { %301 = vmatpush.msra.mxu1 %v237_v29  ;;  %347 = vmatpush.msra.mxu2 %v326_v30 }
  0x17   :  { %273 = vmatpush.msra.mxu0 %v252_v31  ;;  %461 = vmatpush.msra.mxu3 %v252_v31 }
  0x18   :  { %302 = vmatpush.msra.mxu1 %v236_v32  ;;  %348 = vmatpush.msra.mxu2 %v325_v33 }
  0x19   :  { %274 = vmatpush.msra.mxu0 %v251_v34  ;;  %462 = vmatpush.msra.mxu3 %v251_v34 }
  0x1a   :  { %303 = vmatpush.msra.mxu1 %v235_v35  ;;  %349 = vmatpush.msra.mxu2 %v324_v36 }
  0x1b   :  { %275 = vmatpush.msra.mxu0 %v250_v37  ;;  %463 = vmatpush.msra.mxu3 %v250_v37 }
  0x1c   :  { %304 = vmatpush.msra.mxu1 %v234_v38  ;;  %350 = vmatpush.msra.mxu2 %v323_v39 }
  0x1d   :  { %276 = vmatpush.msra.mxu0 %v249_v40  ;;  %464 = vmatpush.msra.mxu3 %v249_v40 }
  0x1e   :  { %305 = vmatpush.msra.mxu1 %v233_v41  ;;  %351 = vmatpush.msra.mxu2 %v322_v42 }
  0x1f   :  { %277 = vmatpush.msra.mxu0 %v248_v43  ;;  %465 = vmatpush.msra.mxu3 %v248_v43 }
  0x20   :  { %306 = vmatpush.msra.mxu1 %v232_v44  ;;  %352 = vmatpush.msra.mxu2 %v321_v45 }
  0x21   :  { %353 = vmatmul.f32.vlgmr.msra.gmra.mxu2 %v224_v46  ;;  %278 = vmatpush.msra.mxu0 %v247_v47 }
  0x22   :  { %307 = vmatpush.msra.mxu1 %v231_v48  ;;  %279 = vmatmul.f32.vlgmr.msra.gmra.mxu0 %v224_v46 }
  0x23   :  { %308 = vmatmul.f32.vlgmr.msra.gmra.mxu1 %v223_v49  ;;  %466 = vmatpush.msra.mxu3 %v247_v47 }
  0x24   :  { %282 = vmatmul.f32.vlgmr.msra.gmra.mxu3 %v226_v50 }
  0x29   :  { %356 = vmatmul.f32.gmra.mxu2 %v226_v50 }
  0x2b   :  { %311 = vmatmul.f32.gmra.mxu1 %v225_v51 }
  0x2c   :  { %285 = vmatmul.f32.gmra.mxu3 %v228_v52 }
  0x31   :  { %359 = vmatmul.f32.gmra.mxu2 %v228_v52 }
  0x33   :  { %314 = vmatmul.f32.gmra.mxu1 %v227_v53 }
  0x34   :  { %288 = vmatmul.f32.gmra.mxu3 %v230_v54 }
  0x39   :  { %362 = vmatmul.f32.gmra.mxu2 %v230_v54 }
  0x3b   :  { %317 = vmatmul.f32.gmra.mxu1 %v229_v55 }
  0x9f   :  { %v280_v57 = vpop.f32.mrf.mxu0 }
  0xa0   :  { %v309_v56 = vpop.f32.mrf.mxu1 }
  0xa1   :  { %v310_v59 = vadd.f32 %v309_v56, %v280_v57 }
  0xa4   :  { %v354_v58 = vpop.f32.mrf.mxu2 }
  0xa5   :  { %v372_v61 = vrot.slane %v354_v58, 7 }
  0xa7   :  { %v383_v62 = vsel %vm371_vm0, %v366_v60, %v372_v61  ;;  %v283_v63 = vpop.f32.mrf.mxu3 }
  0xa8   :  { %v384_v0 = vadd.f32 %v383_v62, %v310_v59  ;;  %v312_v1 = vpop.f32.mrf.mxu1 }
  0xa9   :  { %v313_v3 = vadd.f32 %v312_v1, %v283_v63 }
  0xaa   :  { %415 = vst [vmem:[%s700_s5] sm:$0xff] %v384_v0  ;;  %v429_v20 = vmul.f32 %v384_v0, %v384_v0 }
  0xac   :  { %v357_v2 = vpop.f32.mrf.mxu2 }
  0xad   :  { %v373_v4 = vrot.slane %v357_v2, 7 }
  0xaf   :  { %v374_v5 = vsel %vm371_vm0, %v372_v61, %v373_v4  ;;  %v286_v6 = vpop.f32.mrf.mxu3 }
  0xb0   :  { %v385_v7 = vadd.f32 %v374_v5, %v313_v3  ;;  %v315_v8 = vpop.f32.mrf.mxu1 }
  0xb1   :  { %v316_v10 = vadd.f32 %v315_v8, %v286_v6 }
  0xb2   :  { %416 = vst [vmem:[%s700_s5 + $0x8] sm:$0xff] %v385_v7  ;;  %v430_v16 = vmul.f32 %v385_v7, %v385_v7  ;;  %v419_v21 = vadd.f32 %v385_v7, %v384_v0 }
  0xb4   :  { %v360_v9 = vpop.f32.mrf.mxu2  ;;  %v433_v24 = vadd.f32 %v430_v16, %v429_v20 }
  0xb5   :  { %v375_v11 = vrot.slane %v360_v9, 7 }
  0xb7   :  { %v376_v12 = vsel %vm371_vm0, %v373_v4, %v375_v11  ;;  %v289_v14 = vpop.f32.mrf.mxu3 }
  0xb8   :  { %v386_v13 = vadd.f32 %v376_v12, %v316_v10  ;;  %v318_v15 = vpop.f32.mrf.mxu1 }
  0xb9   :  { %v319_v18 = vadd.f32 %v318_v15, %v289_v14 }
  0xba   :  { %417 = vst [vmem:[%s700_s5 + $0x10] sm:$0xff] %v386_v13  ;;  %v431_v22 = vmul.f32 %v386_v13, %v386_v13  ;;  %v420_v25 = vadd.f32 %v419_v21, %v386_v13 }
  0xbc   :  { %v363_v17 = vpop.f32.mrf.mxu2  ;;  %v434_v27 = vadd.f32 %v433_v24, %v431_v22 }
  0xbd   :  { %v377_v19 = vrot.slane %v363_v17, 7 }
  0xbf   :  { %v378_v23 = vsel %vm371_vm0, %v375_v11, %v377_v19 }
  0xc0   :  { %v387_v26 = vadd.f32 %v378_v23, %v319_v18 }
  0xc2   :  { %418 = vst [vmem:[%s700_s5 + $0x18] sm:$0xff] %v387_v26  ;;  %v421_v28 = vadd.f32 %v420_v25, %v387_v26  ;;  %v432_v29 = vmul.f32 %v387_v26, %v387_v26 }
  0xc4   :  { %v422_v30 = vrot.slane %v421_v28, 4  ;;  %v435_v31 = vadd.f32 %v434_v27, %v432_v29 }
  0xc6   :  { %v423_v32 = vadd.f32 %v422_v30, %v421_v28  ;;  %v436_v33 = vrot.slane %v435_v31, 4 }
  0xc8   :  { %v424_v34 = vrot.slane %v423_v32, 2  ;;  %v437_v35 = vadd.f32 %v436_v33, %v435_v31 }
  0xca   :  { %v425_v36 = vadd.f32 %v424_v34, %v423_v32  ;;  %v438_v37 = vrot.slane %v437_v35, 2 }
  0xcc   :  { %v426_v38 = vrot.slane %v425_v36, 1  ;;  %v439_v39 = vadd.f32 %v438_v37, %v437_v35 }
  0xce   :  { %v427_v40 = vadd.f32 %v426_v38, %v425_v36  ;;  %v440_v41 = vrot.slane %v439_v39, 1 }
  0xd0   :  { %428 = vst [vmem:[%s701_s6] sm:$0x1] %v427_v40  ;;  %v441_v42 = vadd.f32 %v440_v41, %v439_v39 }
  0xd2   :  { %442 = vst [vmem:[%s701_s6 + $0x1] sm:$0x1] %v441_v42 }

// kernel: _lambda_.7
= control target key start
LH: loop header
LB: loop body
LE: loop exit
PB: predicated region body
PF: predicated region fallthrough
CT: control target
= control target key end

     0   :  { %s214_s0 = inlined_call_operand.vmem [shape: f32[8,128], index: 0, kind: input, shape index: {}]   ;;  %s215_s1 = inlined_call_operand.vmem [shape: f32[1,128], index: 1, kind: input, shape index: {}]   ;;  %s216_s2 = inlined_call_operand.vmem [shape: f32[1,128], index: 2, kind: input, shape index: {}]   ;;  %s217_s3 = inlined_call_operand.vmem [shape: f32[128,128], index: 3, kind: input, shape index: {}]   ;;  %s218_s4 = inlined_call_operand.vmem [shape: f32[1,128], index: 4, kind: input, shape index: {}]   ;;  %s219_s5 = inlined_call_operand.hbm [shape: f32[8,128], index: 5, kind: output, shape index: {}]  }
   0x1   :  { %v48_v0 = vld [vmem:[%s217_s3 + $0x78] sm:$0xff]  ;;  %v47_v1 = vld [vmem:[%s217_s3 + $0x70] sm:$0xff]  ;;  %v46_v2 = vld [vmem:[%s217_s3 + $0x68] sm:$0xff] }
   0x2   :  { %53 = vmatpush.msra.mxu0 %v48_v0  ;;  %v45_v3 = vld [vmem:[%s217_s3 + $0x60] sm:$0xff]  ;;  %v44_v4 = vld [vmem:[%s217_s3 + $0x58] sm:$0xff] }
   0x4   :  { %54 = vmatpush.msra.mxu0 %v47_v1 }
   0x6   :  { %55 = vmatpush.msra.mxu0 %v46_v2 }
   0x8   :  { %56 = vmatpush.msra.mxu0 %v45_v3 }
   0x9   :  { %10 = vsyncpa [#allocation3], 0  ;;  %v43_v5 = vld [vmem:[%s217_s3 + $0x50] sm:$0xff]  ;;  %v42_v6 = vld [vmem:[%s217_s3 + $0x48] sm:$0xff]  ;;  %s120_s30 = smov [#allocation2]   ;;  %s81_s9 = sshll.u32 %s219_s5, 4  ;;  %s82_s9 = int_to_ptr.hbm [resolvable:$true] %s81_s9 }
   0xa   :  { %57 = vmatpush.msra.mxu0 %v44_v4  ;;  %v41_v7 = vld [vmem:[%s217_s3 + $0x40] sm:$0xff]  ;;  %v40_v8 = vld [vmem:[%s217_s3 + $0x38] sm:$0xff]  ;;  %v39_v9 = vld [vmem:[%s217_s3 + $0x30] sm:$0xff]  ;;  %s79_s6 = sshll.u32 %s120_s30, 4  ;;  %s80_s6 = int_to_ptr.vmem [resolvable:$true] %s79_s6 }
   0xb   :  { %v91_v10 = vld [vmem:[%s215_s1] ss:$0 sm:$0xff]  ;;  %v38_v12 = vld [vmem:[%s217_s3 + $0x28] sm:$0xff]  ;;  %v36_v16 = vld [vmem:[%s217_s3 + $0x18] sm:$0xff] }
   0xc   :  { %58 = vmatpush.msra.mxu0 %v43_v5  ;;  %v21_v11 = vld [vmem:[%s214_s0] sm:$0xff]  ;;  %v35_v17 = vld [vmem:[%s217_s3 + $0x10] sm:$0xff]  ;;  %v34_v19 = vld [vmem:[%s217_s3 + $0x8] sm:$0xff] }
   0xd   :  { %v37_v13 = vld [vmem:[%s217_s3 + $0x20] sm:$0xff]  ;;  %v26_v14 = vmul.f32 %v91_v10, %v21_v11 }
   0xe   :  { %59 = vmatpush.msra.mxu0 %v42_v6  ;;  %v92_v15 = vld [vmem:[%s216_s2] ss:$0 sm:$0xff] }
   0xf   :  { %v31_v18 = vadd.f32 %v92_v15, %v26_v14  ;;  %v33_v20 = vld [vmem:[%s217_s3] sm:$0xff] }
  0x10   :  { %60 = vmatpush.msra.mxu0 %v41_v7  ;;  %v93_v22 = vld [vmem:[%s218_s4] ss:$0 sm:$0xff] }
  0x11   :  { %v32_v21 = vmax.f32 %v31_v18, 0.0 }
  0x12   :  { %61 = vmatpush.msra.mxu0 %v40_v8 }
  0x14   :  { %62 = vmatpush.msra.mxu0 %v39_v9 }
  0x16   :  { %63 = vmatpush.msra.mxu0 %v38_v12 }
  0x18   :  { %64 = vmatpush.msra.mxu0 %v37_v13 }
  0x1a   :  { %65 = vmatpush.msra.mxu0 %v36_v16 }
  0x1c   :  { %66 = vmatpush.msra.mxu0 %v35_v17 }
  0x1e   :  { %67 = vmatpush.msra.mxu0 %v34_v19 }
  0x20   :  { %68 = vmatpush.msra.mxu0 %v33_v20 }
  0x21   :  { %69 = vmatmul.f32.vlgmr.msra.gmra.mxu0 %v32_v21 }
  0x9e   :  { %v70_v23 = vpop.f32.mrf.mxu0 }
  0x9f   :  { %v71_v24 = vadd.f32 %v93_v22, %v70_v23 }
  0xa1   :  { %73 = vst [vmem:[#allocation2] sm:$0xff] %v71_v24 }
  0xa2   :  { %84 = dma.vmem_to_hbm [thread:$0]  %s80_s6, 128, %s82_s9, [#allocation3]  }
  0xa3   :  { %118 = dma.done.wait [#allocation3], 128  }
  0xa4   :  { %119 = vsyncadd [#allocation3], 4294967168 }
  0xa5   :  { %89 = vsyncpa [#allocation3], 1 }

// kernel: _lambda_.5
= control target key start
LH: loop header
LB: loop body
LE: loop exit
PB: predicated region body
PF: predicated region fallthrough
CT: control target
= control target key end

     0   :  { %vm667_vm0 = vcmask 1040384   ;;  %s1181_s4 = inlined_call_operand.vmem [shape: f32[128,256], index: 4, kind: input, shape index: {}]   ;;  %s1182_s3 = inlined_call_operand.vmem [shape: f32[128,256], index: 3, kind: input, shape index: {}]   ;;  %s1183_s2 = inlined_call_operand.vmem [shape: f32[128,256], index: 2, kind: input, shape index: {}]   ;;  %s1184_s5 = inlined_call_operand.vmem [shape: f32[1,256], index: 5, kind: input, shape index: {}]   ;;  %s1185_s0 = inlined_call_operand.vmem [shape: f32[16,256], index: 0, kind: input, shape index: {}]   ;;  %s1186_s6 = inlined_call_operand.vmem [shape: f32[1,256], index: 6, kind: input, shape index: {}]   ;;  %s1187_s1 = inlined_call_operand.vmem [shape: f32[1,1,256], index: 1, kind: input, shape index: {}]   ;;  %s1188_s7 = inlined_call_operand.vmem [shape: f32[16,256], index: 7, kind: output, shape index: {0}]   ;;  %s1189_s8 = inlined_call_operand.vmem [shape: f32[1,2,256], index: 8, kind: output, shape index: {1}]  }
   0x1   :  { %v485_v0 = vld [vmem:[%s1181_s4 + $0xf0] sm:$0xff]  ;;  %v486_v1 = vld [vmem:[%s1181_s4 + $0xf8] sm:$0xff]  ;;  %v483_v4 = vld [vmem:[%s1181_s4 + $0xe0] sm:$0xff] }
   0x2   :  { %v453_v2 = vld [vmem:[%s1182_s3 + $0xf0] sm:$0xff]  ;;  %487 = vmatpush.msra.mxu0 %v485_v0  ;;  %510 = vmatpush.msra.mxu1 %v486_v1  ;;  %v454_v3 = vld [vmem:[%s1182_s3 + $0xf8] sm:$0xff]  ;;  %v484_v5 = vld [vmem:[%s1181_s4 + $0xe8] sm:$0xff] }
   0x3   :  { %533 = vmatpush.msra.mxu2 %v453_v2  ;;  %556 = vmatpush.msra.mxu3 %v454_v3  ;;  %v451_v6 = vld [vmem:[%s1182_s3 + $0xe0] sm:$0xff]  ;;  %v452_v7 = vld [vmem:[%s1182_s3 + $0xe8] sm:$0xff]  ;;  %v481_v8 = vld [vmem:[%s1181_s4 + $0xd0] sm:$0xff] }
   0x4   :  { %488 = vmatpush.msra.mxu0 %v483_v4  ;;  %511 = vmatpush.msra.mxu1 %v484_v5  ;;  %v482_v9 = vld [vmem:[%s1181_s4 + $0xd8] sm:$0xff]  ;;  %v449_v10 = vld [vmem:[%s1182_s3 + $0xd0] sm:$0xff]  ;;  %v479_v12 = vld [vmem:[%s1181_s4 + $0xc0] sm:$0xff] }
   0x5   :  { %v450_v11 = vld [vmem:[%s1182_s3 + $0xd8] sm:$0xff]  ;;  %534 = vmatpush.msra.mxu2 %v451_v6  ;;  %557 = vmatpush.msra.mxu3 %v452_v7  ;;  %v480_v13 = vld [vmem:[%s1181_s4 + $0xc8] sm:$0xff]  ;;  %v447_v14 = vld [vmem:[%s1182_s3 + $0xc0] sm:$0xff] }
   0x6   :  { %489 = vmatpush.msra.mxu0 %v481_v8  ;;  %512 = vmatpush.msra.mxu1 %v482_v9  ;;  %v448_v15 = vld [vmem:[%s1182_s3 + $0xc8] sm:$0xff]  ;;  %v477_v16 = vld [vmem:[%s1181_s4 + $0xb0] sm:$0xff]  ;;  %v478_v17 = vld [vmem:[%s1181_s4 + $0xb8] sm:$0xff] }
   0x7   :  { %535 = vmatpush.msra.mxu2 %v449_v10  ;;  %558 = vmatpush.msra.mxu3 %v450_v11  ;;  %v445_v18 = vld [vmem:[%s1182_s3 + $0xb0] sm:$0xff]  ;;  %v446_v19 = vld [vmem:[%s1182_s3 + $0xb8] sm:$0xff]  ;;  %v475_v20 = vld [vmem:[%s1181_s4 + $0xa0] sm:$0xff] }
   0x8   :  { %490 = vmatpush.msra.mxu0 %v479_v12  ;;  %513 = vmatpush.msra.mxu1 %v480_v13  ;;  %v476_v21 = vld [vmem:[%s1181_s4 + $0xa8] sm:$0xff]  ;;  %v443_v22 = vld [vmem:[%s1182_s3 + $0xa0] sm:$0xff]  ;;  %v473_v24 = vld [vmem:[%s1181_s4 + $0x90] sm:$0xff] }
   0x9   :  { %536 = vmatpush.msra.mxu2 %v447_v14  ;;  %559 = vmatpush.msra.mxu3 %v448_v15  ;;  %v444_v23 = vld [vmem:[%s1182_s3 + $0xa8] sm:$0xff]  ;;  %v474_v25 = vld [vmem:[%s1181_s4 + $0x98] sm:$0xff]  ;;  %v441_v26 = vld [vmem:[%s1182_s3 + $0x90] sm:$0xff] }
   0xa   :  { %491 = vmatpush.msra.mxu0 %v477_v16  ;;  %514 = vmatpush.msra.mxu1 %v478_v17  ;;  %v442_v27 = vld [vmem:[%s1182_s3 + $0x98] sm:$0xff]  ;;  %v471_v28 = vld [vmem:[%s1181_s4 + $0x80] sm:$0xff]  ;;  %v472_v29 = vld [vmem:[%s1181_s4 + $0x88] sm:$0xff] }
   0xb   :  { %537 = vmatpush.msra.mxu2 %v445_v18  ;;  %560 = vmatpush.msra.mxu3 %v446_v19  ;;  %v439_v30 = vld [vmem:[%s1182_s3 + $0x80] sm:$0xff]  ;;  %v440_v31 = vld [vmem:[%s1182_s3 + $0x88] sm:$0xff]  ;;  %v469_v32 = vld [vmem:[%s1181_s4 + $0x70] sm:$0xff] }
   0xc   :  { %492 = vmatpush.msra.mxu0 %v475_v20  ;;  %515 = vmatpush.msra.mxu1 %v476_v21  ;;  %v470_v33 = vld [vmem:[%s1181_s4 + $0x78] sm:$0xff]  ;;  %v437_v34 = vld [vmem:[%s1182_s3 + $0x70] sm:$0xff]  ;;  %v467_v36 = vld [vmem:[%s1181_s4 + $0x60] sm:$0xff] }
   0xd   :  { %538 = vmatpush.msra.mxu2 %v443_v22  ;;  %561 = vmatpush.msra.mxu3 %v444_v23  ;;  %v438_v35 = vld [vmem:[%s1182_s3 + $0x78] sm:$0xff]  ;;  %v468_v37 = vld [vmem:[%s1181_s4 + $0x68] sm:$0xff]  ;;  %v435_v38 = vld [vmem:[%s1182_s3 + $0x60] sm:$0xff] }
   0xe   :  { %493 = vmatpush.msra.mxu0 %v473_v24  ;;  %516 = vmatpush.msra.mxu1 %v474_v25  ;;  %v436_v39 = vld [vmem:[%s1182_s3 + $0x68] sm:$0xff]  ;;  %v465_v40 = vld [vmem:[%s1181_s4 + $0x50] sm:$0xff]  ;;  %v466_v41 = vld [vmem:[%s1181_s4 + $0x58] sm:$0xff] }
   0xf   :  { %539 = vmatpush.msra.mxu2 %v441_v26  ;;  %562 = vmatpush.msra.mxu3 %v442_v27  ;;  %v433_v42 = vld [vmem:[%s1182_s3 + $0x50] sm:$0xff]  ;;  %v434_v43 = vld [vmem:[%s1182_s3 + $0x58] sm:$0xff]  ;;  %v463_v44 = vld [vmem:[%s1181_s4 + $0x40] sm:$0xff] }
  0x10   :  { %494 = vmatpush.msra.mxu0 %v471_v28  ;;  %517 = vmatpush.msra.mxu1 %v472_v29  ;;  %v464_v45 = vld [vmem:[%s1181_s4 + $0x48] sm:$0xff]  ;;  %v431_v46 = vld [vmem:[%s1182_s3 + $0x40] sm:$0xff]  ;;  %v461_v48 = vld [vmem:[%s1181_s4 + $0x30] sm:$0xff] }
  0x11   :  { %540 = vmatpush.msra.mxu2 %v439_v30  ;;  %563 = vmatpush.msra.mxu3 %v440_v31  ;;  %v432_v47 = vld [vmem:[%s1182_s3 + $0x48] sm:$0xff]  ;;  %v462_v49 = vld [vmem:[%s1181_s4 + $0x38] sm:$0xff]  ;;  %v429_v50 = vld [vmem:[%s1182_s3 + $0x30] sm:$0xff] }
  0x12   :  { %495 = vmatpush.msra.mxu0 %v469_v32  ;;  %518 = vmatpush.msra.mxu1 %v470_v33  ;;  %v430_v51 = vld [vmem:[%s1182_s3 + $0x38] sm:$0xff]  ;;  %v459_v52 = vld [vmem:[%s1181_s4 + $0x20] sm:$0xff]  ;;  %v460_v53 = vld [vmem:[%s1181_s4 + $0x28] sm:$0xff] }
  0x13   :  { %541 = vmatpush.msra.mxu2 %v437_v34  ;;  %564 = vmatpush.msra.mxu3 %v438_v35  ;;  %v427_v54 = vld [vmem:[%s1182_s3 + $0x20] sm:$0xff]  ;;  %v428_v55 = vld [vmem:[%s1182_s3 + $0x28] sm:$0xff]  ;;  %v457_v56 = vld [vmem:[%s1181_s4 + $0x10] sm:$0xff] }
  0x14   :  { %496 = vmatpush.msra.mxu0 %v467_v36  ;;  %519 = vmatpush.msra.mxu1 %v468_v37  ;;  %v458_v57 = vld [vmem:[%s1181_s4 + $0x18] sm:$0xff]  ;;  %v425_v58 = vld [vmem:[%s1182_s3 + $0x10] sm:$0xff]  ;;  %v455_v60 = vld [vmem:[%s1181_s4] sm:$0xff] }
  0x15   :  { %542 = vmatpush.msra.mxu2 %v435_v38  ;;  %565 = vmatpush.msra.mxu3 %v436_v39  ;;  %v426_v59 = vld [vmem:[%s1182_s3 + $0x18] sm:$0xff]  ;;  %v456_v61 = vld [vmem:[%s1181_s4 + $0x8] sm:$0xff]  ;;  %v423_v62 = vld [vmem:[%s1182_s3] sm:$0xff] }
  0x16   :  { %497 = vmatpush.msra.mxu0 %v465_v40  ;;  %520 = vmatpush.msra.mxu1 %v466_v41  ;;  %v424_v63 = vld [vmem:[%s1182_s3 + $0x8] sm:$0xff]  ;;  %v609_v0 = vld [vmem:[%s1183_s2 + $0xf0] sm:$0xff]  ;;  %v1032_v1 = vld [vmem:[%s1184_s5] sm:$0x3] }
  0x17   :  { %543 = vmatpush.msra.mxu2 %v433_v42  ;;  %566 = vmatpush.msra.mxu3 %v434_v43  ;;  %v610_v2 = vld [vmem:[%s1183_s2 + $0xf8] sm:$0xff]  ;;  %v607_v3 = vld [vmem:[%s1183_s2 + $0xe0] sm:$0xff]  ;;  %v608_v4 = vld [vmem:[%s1183_s2 + $0xe8] sm:$0xff]  ;;  %v385_v5 = vperm.slane %v1032_v1, 1  ;;  %v384_v9 = vperm.slane %v1032_v1, 0 }
  0x18   :  { %498 = vmatpush.msra.mxu0 %v463_v44  ;;  %521 = vmatpush.msra.mxu1 %v464_v45  ;;  %v605_v6 = vld [vmem:[%s1183_s2 + $0xd0] sm:$0xff]  ;;  %v379_v7 = vld [vmem:[%s1185_s0 + $0x8] sm:$0xff]  ;;  %v1053_v8 = vld [vmem:[%s1186_s6] sm:$0x3] }
  0x19   :  { %544 = vmatpush.msra.mxu2 %v431_v46  ;;  %567 = vmatpush.msra.mxu3 %v432_v47  ;;  %v606_v10 = vld [vmem:[%s1183_s2 + $0xd8] sm:$0xff]  ;;  %v378_v11 = vld [vmem:[%s1185_s0] sm:$0xff]  ;;  %v604_v13 = vld [vmem:[%s1183_s2 + $0xc8] sm:$0xff]  ;;  %v389_v14 = vmul.f32 %v385_v5, %v379_v7  ;;  %v395_v15 = vperm.slane %v1053_v8, 1  ;;  %v394_v18 = vperm.slane %v1053_v8, 0 }
  0x1a   :  { %499 = vmatpush.msra.mxu0 %v461_v48  ;;  %522 = vmatpush.msra.mxu1 %v462_v49  ;;  %v603_v12 = vld [vmem:[%s1183_s2 + $0xc0] sm:$0xff]  ;;  %v601_v16 = vld [vmem:[%s1183_s2 + $0xb0] sm:$0xff]  ;;  %v388_v17 = vmul.f32 %v384_v9, %v378_v11  ;;  %v602_v19 = vld [vmem:[%s1183_s2 + $0xb8] sm:$0xff] }
  0x1b   :  { %545 = vmatpush.msra.mxu2 %v429_v50  ;;  %568 = vmatpush.msra.mxu3 %v430_v51  ;;  %v599_v20 = vld [vmem:[%s1183_s2 + $0xa0] sm:$0xff]  ;;  %v600_v21 = vld [vmem:[%s1183_s2 + $0xa8] sm:$0xff]  ;;  %v399_v22 = vadd.f32 %v395_v15, %v389_v14  ;;  %v597_v23 = vld [vmem:[%s1183_s2 + $0x90] sm:$0xff] }
  0x1c   :  { %500 = vmatpush.msra.mxu0 %v459_v52  ;;  %523 = vmatpush.msra.mxu1 %v460_v53  ;;  %v398_v24 = vadd.f32 %v394_v18, %v388_v17  ;;  %v598_v25 = vld [vmem:[%s1183_s2 + $0x98] sm:$0xff]  ;;  %v595_v26 = vld [vmem:[%s1183_s2 + $0x80] sm:$0xff]  ;;  %v596_v28 = vld [vmem:[%s1183_s2 + $0x88] sm:$0xff] }
  0x1d   :  { %546 = vmatpush.msra.mxu2 %v427_v54  ;;  %569 = vmatpush.msra.mxu3 %v428_v55  ;;  %v381_v27 = vld [vmem:[%s1185_s0 + $0x18] sm:$0xff]  ;;  %v1097_v29 = vmax.f32 %v399_v22, 0.0  ;;  %v380_v30 = vld [vmem:[%s1185_s0 + $0x10] sm:$0xff]  ;;  %v591_v36 = vld [vmem:[%s1183_s2 + $0x60] sm:$0xff] }
  0x1e   :  { %501 = vmatpush.msra.mxu0 %v457_v56  ;;  %524 = vmatpush.msra.mxu1 %v458_v57  ;;  %v402_v31 = vmax.f32 %v398_v24, 0.0  ;;  %v391_v32 = vmul.f32 %v385_v5, %v381_v27  ;;  %v593_v33 = vld [vmem:[%s1183_s2 + $0x70] sm:$0xff]  ;;  %v390_v34 = vmul.f32 %v384_v9, %v380_v30  ;;  %v594_v35 = vld [vmem:[%s1183_s2 + $0x78] sm:$0xff]  ;;  %v592_v37 = vld [vmem:[%s1183_s2 + $0x68] sm:$0xff] }
  0x1f   :  { %547 = vmatpush.msra.mxu2 %v425_v58  ;;  %570 = vmatpush.msra.mxu3 %v426_v59  ;;  %v589_v39 = vld [vmem:[%s1183_s2 + $0x50] sm:$0xff]  ;;  %v590_v41 = vld [vmem:[%s1183_s2 + $0x58] sm:$0xff]  ;;  %v587_v42 = vld [vmem:[%s1183_s2 + $0x40] sm:$0xff] }
  0x20   :  { %502 = vmatpush.msra.mxu0 %v455_v60  ;;  %525 = vmatpush.msra.mxu1 %v456_v61  ;;  %v401_v38 = vadd.f32 %v395_v15, %v391_v32  ;;  %v400_v40 = vadd.f32 %v394_v18, %v390_v34  ;;  %v588_v43 = vld [vmem:[%s1183_s2 + $0x48] sm:$0xff]  ;;  %v585_v46 = vld [vmem:[%s1183_s2 + $0x30] sm:$0xff]  ;;  %v586_v47 = vld [vmem:[%s1183_s2 + $0x38] sm:$0xff] }
  0x21   :  { %548 = vmatpush.msra.mxu2 %v423_v62  ;;  %571 = vmatpush.msra.mxu3 %v424_v63  ;;  %v583_v48 = vld [vmem:[%s1183_s2 + $0x20] sm:$0xff]  ;;  %v584_v49 = vld [vmem:[%s1183_s2 + $0x28] sm:$0xff]  ;;  %v581_v50 = vld [vmem:[%s1183_s2 + $0x10] sm:$0xff] }
  0x22   :  { %611 = vmatpush.msrb.mxu0 %v609_v0  ;;  %634 = vmatpush.msrb.mxu1 %v610_v2  ;;  %v405_v44 = vmax.f32 %v401_v38, 0.0  ;;  %v404_v45 = vmax.f32 %v400_v40, 0.0  ;;  %v582_v51 = vld [vmem:[%s1183_s2 + $0x18] sm:$0xff]  ;;  %v579_v52 = vld [vmem:[%s1183_s2] sm:$0xff]  ;;  %v580_v53 = vld [vmem:[%s1183_s2 + $0x8] sm:$0xff] }
  0x23   :  { %757 = vmatpush.msrb.mxu2 %v609_v0  ;;  %773 = vmatpush.msrb.mxu3 %v610_v2  ;;  %v657_v60 = vld [vmem:[%s1187_s1] sm:$0x3] }
  0x24   :  { %612 = vmatpush.msrb.mxu0 %v607_v3  ;;  %635 = vmatpush.msrb.mxu1 %v608_v4  ;;  %v659_v63 = vperm.slane %v657_v60, 0  ;;  %v660_v1 = vperm.slane %v657_v60, 1 }
  0x25   :  { %758 = vmatpush.msrb.mxu2 %v607_v3  ;;  %774 = vmatpush.msrb.mxu3 %v608_v4 }
  0x26   :  { %613 = vmatpush.msrb.mxu0 %v605_v6  ;;  %636 = vmatpush.msrb.mxu1 %v606_v10 }
  0x27   :  { %759 = vmatpush.msrb.mxu2 %v605_v6  ;;  %775 = vmatpush.msrb.mxu3 %v606_v10 }
  0x28   :  { %614 = vmatpush.msrb.mxu0 %v603_v12  ;;  %637 = vmatpush.msrb.mxu1 %v604_v13 }
  0x29   :  { %760 = vmatpush.msrb.mxu2 %v603_v12  ;;  %776 = vmatpush.msrb.mxu3 %v604_v13 }
  0x2a   :  { %615 = vmatpush.msrb.mxu0 %v601_v16  ;;  %638 = vmatpush.msrb.mxu1 %v602_v19 }
  0x2b   :  { %761 = vmatpush.msrb.mxu2 %v601_v16  ;;  %777 = vmatpush.msrb.mxu3 %v602_v19 }
  0x2c   :  { %616 = vmatpush.msrb.mxu0 %v599_v20  ;;  %639 = vmatpush.msrb.mxu1 %v600_v21 }
  0x2d   :  { %762 = vmatpush.msrb.mxu2 %v599_v20  ;;  %778 = vmatpush.msrb.mxu3 %v600_v21 }
  0x2e   :  { %617 = vmatpush.msrb.mxu0 %v597_v23  ;;  %640 = vmatpush.msrb.mxu1 %v598_v25 }
  0x2f   :  { %763 = vmatpush.msrb.mxu2 %v597_v23  ;;  %779 = vmatpush.msrb.mxu3 %v598_v25 }
  0x30   :  { %618 = vmatpush.msrb.mxu0 %v595_v26  ;;  %641 = vmatpush.msrb.mxu1 %v596_v28 }
  0x31   :  { %764 = vmatpush.msrb.mxu2 %v595_v26  ;;  %780 = vmatpush.msrb.mxu3 %v596_v28 }
  0x32   :  { %503 = vmatmul.f32.vlgmr.msra.gmra.mxu0 %v1097_v29  ;;  %526 = vmatmul.f32.vlgmr.msra.gmra.mxu1 %v1097_v29 }
  0x33   :  { %549 = vmatmul.f32.vlgmr.msra.gmra.mxu2 %v402_v31  ;;  %572 = vmatmul.f32.vlgmr.msra.gmra.mxu3 %v402_v31 }
  0x34   :  { %619 = vmatpush.msrb.mxu0 %v593_v33  ;;  %765 = vmatpush.msrb.mxu2 %v593_v33 }
  0x35   :  { %642 = vmatpush.msrb.mxu1 %v594_v35  ;;  %781 = vmatpush.msrb.mxu3 %v594_v35 }
  0x36   :  { %620 = vmatpush.msrb.mxu0 %v591_v36  ;;  %766 = vmatpush.msrb.mxu2 %v591_v36 }
  0x37   :  { %643 = vmatpush.msrb.mxu1 %v592_v37  ;;  %782 = vmatpush.msrb.mxu3 %v592_v37 }
  0x38   :  { %621 = vmatpush.msrb.mxu0 %v589_v39  ;;  %767 = vmatpush.msrb.mxu2 %v589_v39 }
  0x39   :  { %644 = vmatpush.msrb.mxu1 %v590_v41  ;;  %783 = vmatpush.msrb.mxu3 %v590_v41 }
  0x3a   :  { %622 = vmatpush.msrb.mxu0 %v587_v42  ;;  %768 = vmatpush.msrb.mxu2 %v587_v42 }
  0x3b   :  { %645 = vmatpush.msrb.mxu1 %v588_v43  ;;  %784 = vmatpush.msrb.mxu3 %v588_v43 }
  0x3c   :  { %506 = vmatmul.f32.gmra.mxu0 %v405_v44  ;;  %529 = vmatmul.f32.gmra.mxu1 %v405_v44 }
  0x3d   :  { %552 = vmatmul.f32.gmra.mxu2 %v404_v45  ;;  %575 = vmatmul.f32.gmra.mxu3 %v404_v45 }
  0x3e   :  { %623 = vmatpush.msrb.mxu0 %v585_v46  ;;  %769 = vmatpush.msrb.mxu2 %v585_v46  ;;  %v717_v46 = vlaneseq }
  0x3f   :  { %646 = vmatpush.msrb.mxu1 %v586_v47  ;;  %785 = vmatpush.msrb.mxu3 %v586_v47 }
  0x40   :  { %624 = vmatpush.msrb.mxu0 %v583_v48  ;;  %770 = vmatpush.msrb.mxu2 %v583_v48  ;;  %vm719_vm1 = vcmp.lt.s32.totalorder %v717_v46, 256 }
  0x41   :  { %647 = vmatpush.msrb.mxu1 %v584_v49  ;;  %786 = vmatpush.msrb.mxu3 %v584_v49 }
  0x42   :  { %625 = vmatpush.msrb.mxu0 %v581_v50  ;;  %771 = vmatpush.msrb.mxu2 %v581_v50 }
  0x43   :  { %648 = vmatpush.msrb.mxu1 %v582_v51  ;;  %787 = vmatpush.msrb.mxu3 %v582_v51 }
  0x44   :  { %626 = vmatpush.msrb.mxu0 %v579_v52  ;;  %772 = vmatpush.msrb.mxu2 %v579_v52 }
  0x45   :  { %649 = vmatpush.msrb.mxu1 %v580_v53  ;;  %788 = vmatpush.msrb.mxu3 %v580_v53 }
  0x46   :  { %627 = vmatmul.f32.vlgmr.msrb.gmra.mxu0 %v1097_v29  ;;  %630 = vmatmul.f32.vlgmr.msrb.gmra.mxu2 %v405_v44 }
  0x47   :  { %650 = vmatmul.f32.vlgmr.msrb.gmra.mxu1 %v1097_v29  ;;  %653 = vmatmul.f32.vlgmr.msrb.gmra.mxu3 %v405_v44 }
  0xaf   :  { %v504_v54 = vpop.f32.mrf.mxu0  ;;  %v527_v55 = vpop.f32.mrf.mxu1 }
  0xb6   :  { %v550_v56 = vpop.f32.mrf.mxu2  ;;  %v573_v57 = vpop.f32.mrf.mxu3 }
  0xb7   :  { %v551_v4 = vadd.f32 %v550_v56, %v504_v54  ;;  %v574_v6 = vadd.f32 %v573_v57, %v527_v55 }
  0xb9   :  { %v507_v58 = vpop.f32.mrf.mxu0  ;;  %v530_v59 = vpop.f32.mrf.mxu1 }
  0xc0   :  { %v553_v61 = vpop.f32.mrf.mxu2  ;;  %v576_v62 = vpop.f32.mrf.mxu3 }
  0xc1   :  { %v554_v14 = vadd.f32 %v553_v61, %v507_v58  ;;  %v577_v16 = vadd.f32 %v576_v62, %v530_v59 }
  0xc3   :  { %v628_v0 = vpop.f32.mrf.mxu0 }
  0xc4   :  { %v668_v2 = vrot.slane %v628_v0, 7  ;;  %v651_v3 = vpop.f32.mrf.mxu1 }
  0xc5   :  { %v669_v5 = vrot.slane %v651_v3, 7 }
  0xc6   :  { %v678_v7 = vsel %vm667_vm0, %v659_v63, %v668_v2 }
  0xc7   :  { %v680_v8 = vadd.f32 %v678_v7, %v551_v4  ;;  %v679_v9 = vsel %vm667_vm0, %v660_v1, %v669_v5 }
  0xc8   :  { %v681_v10 = vadd.f32 %v679_v9, %v574_v6 }
  0xc9   :  { %694 = vst [vmem:[%s1188_s7] sm:$0xff] %v680_v8  ;;  %v631_v11 = vpop.f32.mrf.mxu2  ;;  %v722_v21 = vmul.f32 %v680_v8, %v680_v8 }
  0xca   :  { %695 = vst [vmem:[%s1188_s7 + $0x8] sm:$0xff] %v681_v10  ;;  %v670_v12 = vrot.slane %v631_v11, 7  ;;  %v654_v13 = vpop.f32.mrf.mxu3  ;;  %v723_v24 = vmul.f32 %v681_v10, %v681_v10 }
  0xcb   :  { %v672_v15 = vrot.slane %v654_v13, 7 }
  0xcc   :  { %v671_v17 = vsel %vm667_vm0, %v668_v2, %v670_v12 }
  0xcd   :  { %v682_v18 = vadd.f32 %v671_v17, %v554_v14  ;;  %v673_v19 = vsel %vm667_vm0, %v669_v5, %v672_v15 }
  0xce   :  { %v683_v20 = vadd.f32 %v673_v19, %v577_v16 }
  0xcf   :  { %696 = vst [vmem:[%s1188_s7 + $0x10] sm:$0xff] %v682_v18  ;;  %v698_v22 = vadd.f32 %v682_v18, %v680_v8  ;;  %v724_v23 = vmul.f32 %v682_v18, %v682_v18 }
  0xd0   :  { %697 = vst [vmem:[%s1188_s7 + $0x18] sm:$0xff] %v683_v20  ;;  %v705_v25 = vadd.f32 %v683_v20, %v681_v10  ;;  %v725_v26 = vmul.f32 %v683_v20, %v683_v20 }
  0xd1   :  { %v699_v27 = vrot.slane %v698_v22, 4  ;;  %v726_v28 = vadd.f32 %v724_v23, %v722_v21 }
  0xd2   :  { %v706_v29 = vrot.slane %v705_v25, 4  ;;  %v733_v30 = vadd.f32 %v725_v26, %v723_v24 }
  0xd3   :  { %v700_v31 = vadd.f32 %v699_v27, %v698_v22  ;;  %v727_v32 = vrot.slane %v726_v28, 4 }
  0xd4   :  { %v707_v33 = vadd.f32 %v706_v29, %v705_v25  ;;  %v734_v34 = vrot.slane %v733_v30, 4 }
  0xd5   :  { %v701_v35 = vrot.slane %v700_v31, 2  ;;  %v728_v36 = vadd.f32 %v727_v32, %v726_v28 }
  0xd6   :  { %v708_v37 = vrot.slane %v707_v33, 2  ;;  %v735_v38 = vadd.f32 %v734_v34, %v733_v30 }
  0xd7   :  { %v702_v39 = vadd.f32 %v701_v35, %v700_v31  ;;  %v729_v40 = vrot.slane %v728_v36, 2 }
  0xd8   :  { %v709_v41 = vadd.f32 %v708_v37, %v707_v33  ;;  %v736_v42 = vrot.slane %v735_v38, 2 }
  0xd9   :  { %v730_v43 = vadd.f32 %v729_v40, %v728_v36  ;;  %v703_v44 = vrot.slane %v702_v39, 1 }
  0xda   :  { %v710_v45 = vrot.slane %v709_v41, 1  ;;  %v737_v47 = vadd.f32 %v736_v42, %v735_v38 }
  0xdb   :  { %v731_v48 = vrot.slane %v730_v43, 1  ;;  %v704_v51 = vadd.f32 %v703_v44, %v702_v39 }
  0xdc   :  { %v711_v49 = vadd.f32 %v710_v45, %v709_v41  ;;  %v738_v50 = vrot.slane %v737_v47, 1 }
  0xdd   :  { %v732_v54 = vadd.f32 %v731_v48, %v730_v43 }
  0xde   :  { %v714_v52 = vrot.slane %v711_v49, 7  ;;  %v739_v53 = vadd.f32 %v738_v50, %v737_v47 }
  0xe0   :  { %v715_v55 = vsel %vm667_vm0, %v704_v51, %v714_v52  ;;  %v742_v56 = vrot.slane %v739_v53, 7 }
  0xe1   :  { %721 = vst.msk [vmem:[%s1189_s8] ss:$2 sm:$0x3] %vm719_vm1, %v715_v55 }
  0xe2   :  { %v743_v57 = vsel %vm667_vm0, %v732_v54, %v742_v56 }
  0xe3   :  { %756 = vst.msk [vmem:[%s1189_s8 + $0x1] ss:$2 sm:$0x3] %vm719_vm1, %v743_v57 }

// kernel: _lambda_.6
= control target key start
LH: loop header
LB: loop body
LE: loop exit
PB: predicated region body
PF: predicated region fallthrough
CT: control target
= control target key end

     0   :  { %vm579_vm0 = vcmask 1040384   ;;  %s976_s4 = inlined_call_operand.vmem [shape: f32[256,128], index: 4, kind: input, shape index: {}]   ;;  %s977_s3 = inlined_call_operand.vmem [shape: f32[256,128], index: 3, kind: input, shape index: {}]   ;;  %s978_s0 = inlined_call_operand.vmem [shape: f32[8,512], index: 0, kind: input, shape index: {}]   ;;  %s979_s5 = inlined_call_operand.vmem [shape: f32[1,512], index: 5, kind: input, shape index: {}]   ;;  %s980_s6 = inlined_call_operand.vmem [shape: f32[1,512], index: 6, kind: input, shape index: {}]   ;;  %s981_s2 = inlined_call_operand.vmem [shape: f32[256,128], index: 2, kind: input, shape index: {}]   ;;  %s982_s1 = inlined_call_operand.vmem [shape: f32[1,1,128], index: 1, kind: input, shape index: {}]   ;;  %s983_s7 = inlined_call_operand.vmem [shape: f32[8,128], index: 7, kind: output, shape index: {0}]   ;;  %s984_s8 = inlined_call_operand.vmem [shape: f32[1,2,128], index: 8, kind: output, shape index: {1}]  }
   0x1   :  { %v406_v0 = vld [vmem:[%s976_s4 + $0x78] sm:$0xff]  ;;  %v405_v2 = vld [vmem:[%s976_s4 + $0x70] sm:$0xff]  ;;  %v404_v4 = vld [vmem:[%s976_s4 + $0x68] sm:$0xff] }
   0x2   :  { %v422_v1 = vld [vmem:[%s976_s4 + $0xf8] sm:$0xff]  ;;  %423 = vmatpush.msra.mxu0 %v406_v0  ;;  %v421_v3 = vld [vmem:[%s976_s4 + $0xf0] sm:$0xff]  ;;  %v420_v5 = vld [vmem:[%s976_s4 + $0xe8] sm:$0xff] }
   0x3   :  { %443 = vmatpush.msra.mxu1 %v422_v1  ;;  %v403_v6 = vld [vmem:[%s976_s4 + $0x60] sm:$0xff]  ;;  %v402_v8 = vld [vmem:[%s976_s4 + $0x58] sm:$0xff]  ;;  %v373_v11 = vld [vmem:[%s977_s3 + $0x70] sm:$0xff] }
   0x4   :  { %424 = vmatpush.msra.mxu0 %v405_v2  ;;  %v419_v7 = vld [vmem:[%s976_s4 + $0xe0] sm:$0xff]  ;;  %v418_v9 = vld [vmem:[%s976_s4 + $0xd8] sm:$0xff]  ;;  %v401_v12 = vld [vmem:[%s976_s4 + $0x50] sm:$0xff] }
   0x5   :  { %444 = vmatpush.msra.mxu1 %v421_v3  ;;  %v374_v10 = vld [vmem:[%s977_s3 + $0x78] sm:$0xff]  ;;  %v417_v13 = vld [vmem:[%s976_s4 + $0xd0] sm:$0xff]  ;;  %v372_v15 = vld [vmem:[%s977_s3 + $0x68] sm:$0xff] }
   0x6   :  { %425 = vmatpush.msra.mxu0 %v404_v4  ;;  %463 = vmatpush.msra.mxu2 %v374_v10  ;;  %v390_v14 = vld [vmem:[%s977_s3 + $0xf8] sm:$0xff]  ;;  %v389_v16 = vld [vmem:[%s977_s3 + $0xf0] sm:$0xff]  ;;  %v400_v17 = vld [vmem:[%s976_s4 + $0x48] sm:$0xff] }
   0x7   :  { %445 = vmatpush.msra.mxu1 %v420_v5  ;;  %v416_v18 = vld [vmem:[%s976_s4 + $0xc8] sm:$0xff]  ;;  %483 = vmatpush.msra.mxu3 %v390_v14  ;;  %v371_v19 = vld [vmem:[%s977_s3 + $0x60] sm:$0xff]  ;;  %v370_v23 = vld [vmem:[%s977_s3 + $0x58] sm:$0xff] }
   0x8   :  { %426 = vmatpush.msra.mxu0 %v403_v6  ;;  %464 = vmatpush.msra.mxu2 %v373_v11  ;;  %v388_v20 = vld [vmem:[%s977_s3 + $0xe8] sm:$0xff]  ;;  %v399_v21 = vld [vmem:[%s976_s4 + $0x40] sm:$0xff]  ;;  %v398_v25 = vld [vmem:[%s976_s4 + $0x38] sm:$0xff] }
   0x9   :  { %446 = vmatpush.msra.mxu1 %v419_v7  ;;  %v415_v22 = vld [vmem:[%s976_s4 + $0xc0] sm:$0xff]  ;;  %484 = vmatpush.msra.mxu3 %v389_v16  ;;  %v414_v26 = vld [vmem:[%s976_s4 + $0xb8] sm:$0xff]  ;;  %v369_v27 = vld [vmem:[%s977_s3 + $0x50] sm:$0xff] }
   0xa   :  { %427 = vmatpush.msra.mxu0 %v402_v8  ;;  %465 = vmatpush.msra.mxu2 %v372_v15  ;;  %v387_v24 = vld [vmem:[%s977_s3 + $0xe0] sm:$0xff]  ;;  %v386_v28 = vld [vmem:[%s977_s3 + $0xd8] sm:$0xff]  ;;  %v397_v29 = vld [vmem:[%s976_s4 + $0x30] sm:$0xff] }
   0xb   :  { %447 = vmatpush.msra.mxu1 %v418_v9  ;;  %485 = vmatpush.msra.mxu3 %v388_v20  ;;  %v413_v30 = vld [vmem:[%s976_s4 + $0xb0] sm:$0xff]  ;;  %v368_v31 = vld [vmem:[%s977_s3 + $0x48] sm:$0xff]  ;;  %v367_v35 = vld [vmem:[%s977_s3 + $0x40] sm:$0xff] }
   0xc   :  { %428 = vmatpush.msra.mxu0 %v401_v12  ;;  %466 = vmatpush.msra.mxu2 %v371_v19  ;;  %v385_v32 = vld [vmem:[%s977_s3 + $0xd0] sm:$0xff]  ;;  %v396_v33 = vld [vmem:[%s976_s4 + $0x28] sm:$0xff]  ;;  %v395_v37 = vld [vmem:[%s976_s4 + $0x20] sm:$0xff] }
   0xd   :  { %448 = vmatpush.msra.mxu1 %v417_v13  ;;  %486 = vmatpush.msra.mxu3 %v387_v24  ;;  %v412_v34 = vld [vmem:[%s976_s4 + $0xa8] sm:$0xff]  ;;  %v411_v38 = vld [vmem:[%s976_s4 + $0xa0] sm:$0xff]  ;;  %v366_v39 = vld [vmem:[%s977_s3 + $0x38] sm:$0xff] }
   0xe   :  { %429 = vmatpush.msra.mxu0 %v400_v17  ;;  %467 = vmatpush.msra.mxu2 %v370_v23  ;;  %v384_v36 = vld [vmem:[%s977_s3 + $0xc8] sm:$0xff]  ;;  %v383_v40 = vld [vmem:[%s977_s3 + $0xc0] sm:$0xff]  ;;  %v394_v41 = vld [vmem:[%s976_s4 + $0x18] sm:$0xff] }
   0xf   :  { %449 = vmatpush.msra.mxu1 %v416_v18  ;;  %487 = vmatpush.msra.mxu3 %v386_v28  ;;  %v410_v42 = vld [vmem:[%s976_s4 + $0x98] sm:$0xff]  ;;  %v365_v43 = vld [vmem:[%s977_s3 + $0x30] sm:$0xff]  ;;  %v364_v47 = vld [vmem:[%s977_s3 + $0x28] sm:$0xff] }
  0x10   :  { %430 = vmatpush.msra.mxu0 %v399_v21  ;;  %468 = vmatpush.msra.mxu2 %v369_v27  ;;  %v382_v44 = vld [vmem:[%s977_s3 + $0xb8] sm:$0xff]  ;;  %v393_v45 = vld [vmem:[%s976_s4 + $0x10] sm:$0xff]  ;;  %v392_v49 = vld [vmem:[%s976_s4 + $0x8] sm:$0xff] }
  0x11   :  { %450 = vmatpush.msra.mxu1 %v415_v22  ;;  %488 = vmatpush.msra.mxu3 %v385_v32  ;;  %v409_v46 = vld [vmem:[%s976_s4 + $0x90] sm:$0xff]  ;;  %v408_v50 = vld [vmem:[%s976_s4 + $0x88] sm:$0xff]  ;;  %v391_v51 = vld [vmem:[%s976_s4] sm:$0xff] }
  0x12   :  { %431 = vmatpush.msra.mxu0 %v398_v25  ;;  %469 = vmatpush.msra.mxu2 %v368_v31  ;;  %v381_v48 = vld [vmem:[%s977_s3 + $0xb0] sm:$0xff]  ;;  %v407_v52 = vld [vmem:[%s976_s4 + $0x80] sm:$0xff]  ;;  %v380_v54 = vld [vmem:[%s977_s3 + $0xa8] sm:$0xff] }
  0x13   :  { %451 = vmatpush.msra.mxu1 %v414_v26  ;;  %489 = vmatpush.msra.mxu3 %v384_v36  ;;  %v363_v53 = vld [vmem:[%s977_s3 + $0x20] sm:$0xff]  ;;  %v518_v58 = vld [vmem:[%s981_s2 + $0x78] sm:$0xff]  ;;  %v312_v62 = vld [vmem:[%s978_s0 + $0x8] sm:$0xff] }
  0x14   :  { %432 = vmatpush.msra.mxu0 %v397_v29  ;;  %470 = vmatpush.msra.mxu2 %v367_v35  ;;  %v311_v55 = vld [vmem:[%s978_s0] sm:$0xff]  ;;  %v534_v59 = vld [vmem:[%s981_s2 + $0xf8] sm:$0xff]  ;;  %v313_v3 = vld [vmem:[%s978_s0 + $0x10] sm:$0xff] }
  0x15   :  { %452 = vmatpush.msra.mxu1 %v413_v30  ;;  %490 = vmatpush.msra.mxu3 %v383_v40  ;;  %v315_v56 = vld [vmem:[%s979_s5] sm:$0xf]  ;;  %v362_v0 = vld [vmem:[%s977_s3 + $0x18] sm:$0xff]  ;;  %v517_v5 = vld [vmem:[%s981_s2 + $0x70] sm:$0xff] }
  0x16   :  { %433 = vmatpush.msra.mxu0 %v396_v33  ;;  %471 = vmatpush.msra.mxu2 %v366_v39  ;;  %v329_v57 = vld [vmem:[%s980_s6] sm:$0xf]  ;;  %v317_v60 = vperm.slane %v315_v56, 0  ;;  %v318_v63 = vperm.slane %v315_v56, 1  ;;  %v319_v4 = vperm.slane %v315_v56, 2  ;;  %v533_v6 = vld [vmem:[%s981_s2 + $0xf0] sm:$0xff] }
  0x17   :  { %453 = vmatpush.msra.mxu1 %v412_v34  ;;  %491 = vmatpush.msra.mxu3 %v382_v44  ;;  %v331_v61 = vperm.slane %v329_v57, 0  ;;  %v379_v1 = vld [vmem:[%s977_s3 + $0xa0] sm:$0xff]  ;;  %v332_v2 = vperm.slane %v329_v57, 1  ;;  %v333_v9 = vperm.slane %v329_v57, 2  ;;  %v314_v10 = vld [vmem:[%s978_s0 + $0x18] sm:$0xff]  ;;  %v320_v11 = vperm.slane %v315_v56, 3 }
  0x18   :  { %434 = vmatpush.msra.mxu0 %v395_v37  ;;  %472 = vmatpush.msra.mxu2 %v365_v43  ;;  %v325_v7 = vmul.f32 %v317_v60, %v311_v55  ;;  %v326_v8 = vmul.f32 %v318_v63, %v312_v62  ;;  %v361_v12 = vld [vmem:[%s977_s3 + $0x10] sm:$0xff]  ;;  %v378_v13 = vld [vmem:[%s977_s3 + $0x98] sm:$0xff]  ;;  %v327_v14 = vmul.f32 %v319_v4, %v313_v3  ;;  %v516_v15 = vld [vmem:[%s981_s2 + $0x68] sm:$0xff]  ;;  %v334_v19 = vperm.slane %v329_v57, 3 }
  0x19   :  { %454 = vmatpush.msra.mxu1 %v411_v38  ;;  %492 = vmatpush.msra.mxu3 %v381_v48  ;;  %v532_v16 = vld [vmem:[%s981_s2 + $0xe8] sm:$0xff]  ;;  %v328_v18 = vmul.f32 %v320_v11, %v314_v10  ;;  %v377_v21 = vld [vmem:[%s977_s3 + $0x90] sm:$0xff]  ;;  %v515_v22 = vld [vmem:[%s981_s2 + $0x60] sm:$0xff] }
  0x1a   :  { %435 = vmatpush.msra.mxu0 %v394_v41  ;;  %473 = vmatpush.msra.mxu2 %v364_v47  ;;  %v339_v17 = vadd.f32 %v331_v61, %v325_v7  ;;  %v360_v20 = vld [vmem:[%s977_s3 + $0x8] sm:$0xff]  ;;  %v531_v23 = vld [vmem:[%s981_s2 + $0xe0] sm:$0xff]  ;;  %v340_v24 = vadd.f32 %v332_v2, %v326_v8  ;;  %v880_v25 = vadd.f32 %v333_v9, %v327_v14  ;;  %v514_v28 = vld [vmem:[%s981_s2 + $0x58] sm:$0xff] }
  0x1b   :  { %455 = vmatpush.msra.mxu1 %v410_v42  ;;  %493 = vmatpush.msra.mxu3 %v380_v54  ;;  %v359_v26 = vld [vmem:[%s977_s3] sm:$0xff]  ;;  %v376_v27 = vld [vmem:[%s977_s3 + $0x88] sm:$0xff]  ;;  %v530_v29 = vld [vmem:[%s981_s2 + $0xd8] sm:$0xff]  ;;  %v342_v31 = vadd.f32 %v334_v19, %v328_v18 }
  0x1c   :  { %436 = vmatpush.msra.mxu0 %v393_v45  ;;  %474 = vmatpush.msra.mxu2 %v363_v53  ;;  %v343_v30 = vmax.f32 %v339_v17, 0.0  ;;  %v375_v32 = vld [vmem:[%s977_s3 + $0x80] sm:$0xff]  ;;  %v513_v33 = vld [vmem:[%s981_s2 + $0x50] sm:$0xff]  ;;  %v344_v35 = vmax.f32 %v340_v24, 0.0  ;;  %v345_v36 = vmax.f32 %v880_v25, 0.0  ;;  %v512_v37 = vld [vmem:[%s981_s2 + $0x48] sm:$0xff] }
  0x1d   :  { %456 = vmatpush.msra.mxu1 %v409_v46  ;;  %494 = vmatpush.msra.mxu3 %v379_v1  ;;  %v529_v34 = vld [vmem:[%s981_s2 + $0xd0] sm:$0xff]  ;;  %v528_v38 = vld [vmem:[%s981_s2 + $0xc8] sm:$0xff]  ;;  %v346_v39 = vmax.f32 %v342_v31, 0.0  ;;  %v511_v40 = vld [vmem:[%s981_s2 + $0x40] sm:$0xff] }
  0x1e   :  { %437 = vmatpush.msra.mxu0 %v392_v49  ;;  %475 = vmatpush.msra.mxu2 %v362_v0  ;;  %v527_v41 = vld [vmem:[%s981_s2 + $0xc0] sm:$0xff]  ;;  %v510_v42 = vld [vmem:[%s981_s2 + $0x38] sm:$0xff]  ;;  %v509_v44 = vld [vmem:[%s981_s2 + $0x30] sm:$0xff] }
  0x1f   :  { %457 = vmatpush.msra.mxu1 %v408_v50  ;;  %495 = vmatpush.msra.mxu3 %v378_v13  ;;  %v526_v43 = vld [vmem:[%s981_s2 + $0xb8] sm:$0xff]  ;;  %v525_v45 = vld [vmem:[%s981_s2 + $0xb0] sm:$0xff]  ;;  %v508_v46 = vld [vmem:[%s981_s2 + $0x28] sm:$0xff] }
  0x20   :  { %438 = vmatpush.msra.mxu0 %v391_v51  ;;  %476 = vmatpush.msra.mxu2 %v361_v12  ;;  %v524_v47 = vld [vmem:[%s981_s2 + $0xa8] sm:$0xff]  ;;  %v507_v48 = vld [vmem:[%s981_s2 + $0x20] sm:$0xff]  ;;  %v506_v50 = vld [vmem:[%s981_s2 + $0x18] sm:$0xff] }
  0x21   :  { %458 = vmatpush.msra.mxu1 %v407_v52  ;;  %496 = vmatpush.msra.mxu3 %v377_v21  ;;  %v523_v49 = vld [vmem:[%s981_s2 + $0xa0] sm:$0xff]  ;;  %v522_v51 = vld [vmem:[%s981_s2 + $0x98] sm:$0xff]  ;;  %v505_v52 = vld [vmem:[%s981_s2 + $0x10] sm:$0xff] }
  0x22   :  { %535 = vmatpush.msrb.mxu0 %v518_v58  ;;  %477 = vmatpush.msra.mxu2 %v360_v20  ;;  %v521_v53 = vld [vmem:[%s981_s2 + $0x90] sm:$0xff]  ;;  %v504_v54 = vld [vmem:[%s981_s2 + $0x8] sm:$0xff]  ;;  %v503_v56 = vld [vmem:[%s981_s2] sm:$0xff] }
  0x23   :  { %555 = vmatpush.msrb.mxu1 %v534_v59  ;;  %497 = vmatpush.msra.mxu3 %v376_v27  ;;  %v520_v55 = vld [vmem:[%s981_s2 + $0x88] sm:$0xff]  ;;  %v519_v57 = vld [vmem:[%s981_s2 + $0x80] sm:$0xff] }
  0x24   :  { %536 = vmatpush.msrb.mxu0 %v517_v5  ;;  %478 = vmatpush.msra.mxu2 %v359_v26  ;;  %v575_v3 = vld [vmem:[%s982_s1] sm:$0x1] }
  0x25   :  { %556 = vmatpush.msrb.mxu1 %v533_v6  ;;  %479 = vmatmul.f32.vlgmr.msra.gmra.mxu2 %v343_v30 }
  0x26   :  { %537 = vmatpush.msrb.mxu0 %v516_v15  ;;  %498 = vmatpush.msra.mxu3 %v375_v32 }
  0x27   :  { %557 = vmatpush.msrb.mxu1 %v532_v16  ;;  %499 = vmatmul.f32.vlgmr.msra.gmra.mxu3 %v344_v35 }
  0x28   :  { %538 = vmatpush.msrb.mxu0 %v515_v22  ;;  %459 = vmatmul.f32.vlgmr.msra.gmra.mxu1 %v346_v39 }
  0x29   :  { %558 = vmatpush.msrb.mxu1 %v531_v23  ;;  %439 = vmatmul.f32.vlgmr.msra.gmra.mxu0 %v345_v36 }
  0x2a   :  { %539 = vmatpush.msrb.mxu0 %v514_v28 }
  0x2b   :  { %559 = vmatpush.msrb.mxu1 %v530_v29 }
  0x2c   :  { %540 = vmatpush.msrb.mxu0 %v513_v33 }
  0x2d   :  { %560 = vmatpush.msrb.mxu1 %v529_v34 }
  0x2e   :  { %541 = vmatpush.msrb.mxu0 %v512_v37 }
  0x2f   :  { %561 = vmatpush.msrb.mxu1 %v528_v38 }
  0x30   :  { %542 = vmatpush.msrb.mxu0 %v511_v40 }
  0x31   :  { %562 = vmatpush.msrb.mxu1 %v527_v41 }
  0x32   :  { %543 = vmatpush.msrb.mxu0 %v510_v42 }
  0x33   :  { %563 = vmatpush.msrb.mxu1 %v526_v43 }
  0x34   :  { %544 = vmatpush.msrb.mxu0 %v509_v44 }
  0x35   :  { %564 = vmatpush.msrb.mxu1 %v525_v45 }
  0x36   :  { %545 = vmatpush.msrb.mxu0 %v508_v46 }
  0x37   :  { %565 = vmatpush.msrb.mxu1 %v524_v47 }
  0x38   :  { %546 = vmatpush.msrb.mxu0 %v507_v48 }
  0x39   :  { %566 = vmatpush.msrb.mxu1 %v523_v49 }
  0x3a   :  { %547 = vmatpush.msrb.mxu0 %v506_v50 }
  0x3b   :  { %567 = vmatpush.msrb.mxu1 %v522_v51 }
  0x3c   :  { %548 = vmatpush.msrb.mxu0 %v505_v52 }
  0x3d   :  { %568 = vmatpush.msrb.mxu1 %v521_v53 }
  0x3e   :  { %549 = vmatpush.msrb.mxu0 %v504_v54 }
  0x3f   :  { %569 = vmatpush.msrb.mxu1 %v520_v55 }
  0x40   :  { %550 = vmatpush.msrb.mxu0 %v503_v56 }
  0x41   :  { %570 = vmatpush.msrb.mxu1 %v519_v57  ;;  %551 = vmatmul.f32.vlgmr.msrb.gmra.mxu0 %v345_v36 }
  0x42   :  { %571 = vmatmul.f32.vlgmr.msrb.gmra.mxu1 %v346_v39 }
  0xa5   :  { %v460_v59 = vpop.f32.mrf.mxu1 }
  0xa6   :  { %v440_v58 = vpop.f32.mrf.mxu0 }
  0xa7   :  { %v461_v60 = vadd.f32 %v460_v59, %v440_v58 }
  0xa8   :  { %v480_v61 = vpop.f32.mrf.mxu2 }
  0xa9   :  { %v481_v62 = vadd.f32 %v480_v61, %v461_v60 }
  0xaa   :  { %v500_v1 = vpop.f32.mrf.mxu3 }
  0xab   :  { %v501_v5 = vadd.f32 %v500_v1, %v481_v62 }
  0xbe   :  { %v552_v63 = vpop.f32.mrf.mxu0 }
  0xbf   :  { %v572_v0 = vpop.f32.mrf.mxu1 }
  0xc0   :  { %v573_v2 = vadd.f32 %v572_v0, %v552_v63 }
  0xc2   :  { %v577_v4 = vrot.slane %v573_v2, 7 }
  0xc4   :  { %v580_v6 = vsel %vm579_vm0, %v575_v3, %v577_v4 }
  0xc5   :  { %v581_v7 = vadd.f32 %v580_v6, %v501_v5 }
  0xc7   :  { %586 = vst [vmem:[%s983_s7] sm:$0xff] %v581_v7  ;;  %v587_v8 = vrot.slane %v581_v7, 4  ;;  %v594_v9 = vmul.f32 %v581_v7, %v581_v7 }
  0xc9   :  { %v588_v10 = vadd.f32 %v587_v8, %v581_v7  ;;  %v595_v11 = vrot.slane %v594_v9, 4 }
  0xcb   :  { %v589_v12 = vrot.slane %v588_v10, 2  ;;  %v596_v13 = vadd.f32 %v595_v11, %v594_v9 }
  0xcd   :  { %v590_v14 = vadd.f32 %v589_v12, %v588_v10  ;;  %v597_v15 = vrot.slane %v596_v13, 2 }
  0xcf   :  { %v591_v16 = vrot.slane %v590_v14, 1  ;;  %v598_v17 = vadd.f32 %v597_v15, %v596_v13 }
  0xd1   :  { %v592_v18 = vadd.f32 %v591_v16, %v590_v14  ;;  %v599_v19 = vrot.slane %v598_v17, 1 }
  0xd3   :  { %593 = vst [vmem:[%s984_s8] sm:$0x1] %v592_v18  ;;  %v600_v20 = vadd.f32 %v599_v19, %v598_v17 }
  0xd5   :  { %601 = vst [vmem:[%s984_s8 + $0x1] sm:$0x1] %v600_v20 }

</bundles_post_ra>
